<compile_context>
chip_gen: v7x
topology: tpu7x:2x2x1
jax: 0.10.0
libtpu: 0.0.40
codegen_flags: <defaults>
</compile_context>

<pallas_src>
import functools

import jax
import jax.numpy as jnp
from jax.experimental import pallas as pl
from jax.experimental.pallas import tpu as pltpu

BN_EPS = 1e-5


def _round_up(n, m):
    return ((n + m - 1) // m) * m


# ----------------------------------------------------------------------------
# Fused Pallas kernel: all layers back-to-back on VMEM-resident weights.
#   refs = (x_ref, w0, p0, w1, p1, ..., w{L-1}, p{L-1}, o_ref)
#   w_l : (Din_p, Dout_p) bf16 weight (zero padded, laid out for x @ W)
#   p_l : (2, Dout_p) f32 [gamma; beta]   for BN layers (l < L-1)
#         (1, Dout_p) f32 [bias]          for the final layer
# ----------------------------------------------------------------------------
def _qnet_fused_kernel(*refs, n_layers):
    x_ref = refs[0]
    o_ref = refs[-1]

    h = x_ref[...]  # f32 activations, stay on-chip for the whole network
    for l in range(n_layers):
        w = refs[1 + 2 * l][...]        # (Din_p, Dout_p) bf16
        p = refs[2 + 2 * l][...]        # small f32 per-feature params

        # MXU matmul: bf16 x bf16 -> f32 accumulate.
        y = jnp.dot(h.astype(w.dtype), w, preferred_element_type=jnp.float32)

        if l < n_layers - 1:
            gamma = p[0:1, :]
            beta = p[1:2, :]
            # BatchNorm1d (training mode): batch mean / biased batch variance.
            # NOTE: the Linear bias is omitted here -- BN's mean subtraction
            # cancels it exactly, so skipping it preserves the semantics.
            mean = jnp.mean(y, axis=0, keepdims=True)          # (1, Dout)
            c = y - mean                                       # centered
            var = jnp.mean(c * c, axis=0, keepdims=True)       # (1, Dout)
            # Per-feature scale computed once on the (1, Dout) row; only one
            # mul + add per element on the big tile (rsqrt goes to the EUP).
            scale = gamma * jax.lax.rsqrt(var + BN_EPS)        # (1, Dout)
            h = jnp.maximum(c * scale + beta, 0.0)             # affine + ReLU
        else:
            h = y + p[0:1, :]                                  # final bias

    o_ref[...] = h.astype(o_ref.dtype)


# ----------------------------------------------------------------------------
# Parameter construction (torch-Linear-style uniform init) and packing.
# ----------------------------------------------------------------------------
def init_qnetwork_params(base_dim, key):
    dims = [
        (base_dim * 4, base_dim * 2),
        (base_dim * 2, base_dim * 1),
        (base_dim * 1, base_dim // 2),
        (base_dim // 2, base_dim // 2),
        (base_dim // 2, base_dim // 2),
        (base_dim // 2, base_dim // 2),
        (base_dim // 2, base_dim),
        (base_dim, base_dim),
    ]
    params = []
    for (din, dout) in dims:
        key, kw, kb = jax.random.split(key, 3)
        bound = 1.0 / jnp.sqrt(jnp.float32(din))
        w = jax.random.uniform(kw, (din, dout), jnp.float32, -bound, bound)
        b = jax.random.uniform(kb, (dout,), jnp.float32, -bound, bound)
        gamma = jnp.ones((dout,), jnp.float32)   # BN weight init
        beta = jnp.zeros((dout,), jnp.float32)   # BN bias init
        params.append({"w": w, "b": b, "gamma": gamma, "beta": beta})
    return params


def pack_qnetwork_params(params):
    """Pad feature dims to multiples of 128, cast weights to bf16, and pack the
    small per-feature params into one f32 array per layer:
      BN layers   -> (2, Dout_p): [gamma; beta]
      final layer -> (1, Dout_p): [bias]
    """
    n_layers = len(params)
    packed = []
    dims = []
    for i, layer in enumerate(params):
        din, dout = layer["w"].shape
        dinp, doutp = _round_up(din, 128), _round_up(dout, 128)

        w = jnp.zeros((dinp, doutp), jnp.bfloat16)
        w = w.at[:din, :dout].set(layer["w"].astype(jnp.bfloat16))

        if i < n_layers - 1:
            p = jnp.zeros((2, doutp), jnp.float32)
            p = p.at[0, :dout].set(layer["gamma"])
            p = p.at[1, :dout].set(layer["beta"])
        else:
            p = jnp.zeros((1, doutp), jnp.float32)
            p = p.at[0, :dout].set(layer["b"])

        packed.extend([w, p])
        dims.append((din, dout, dinp, doutp))
    return packed, tuple(dims)


# ----------------------------------------------------------------------------
# Forward pass: single fused pallas_call.
# ----------------------------------------------------------------------------
@functools.partial(jax.jit, static_argnames=("dims",))
def qnetwork_forward(x, packed, dims):
    B, d0 = x.shape
    n_layers = len(dims)
    d0p = dims[0][2]
    dout_last, doutp_last = dims[-1][1], dims[-1][3]

    # Pad input features to the lane-aligned width (zero padding is exact).
    if d0p != d0:
        x_in = jnp.zeros((B, d0p), x.dtype).at[:, :d0].set(x)
    else:
        x_in = x

    in_specs = [pl.BlockSpec((B, d0p), lambda i: (0, 0))]
    for li, (_, _, dinp, doutp) in enumerate(dims):
        prow = 2 if li < n_layers - 1 else 1
        in_specs.append(pl.BlockSpec((dinp, doutp), lambda i: (0, 0)))
        in_specs.append(pl.BlockSpec((prow, doutp), lambda i: (0, 0)))

    out = pl.pallas_call(
        functools.partial(_qnet_fused_kernel, n_layers=n_layers),
        out_shape=jax.ShapeDtypeStruct((B, doutp_last), jnp.float32),
        grid=(1,),
        in_specs=in_specs,
        out_specs=pl.BlockSpec((B, doutp_last), lambda i: (0, 0)),
        compiler_params=pltpu.CompilerParams(
            dimension_semantics=("arbitrary",),
            vmem_limit_bytes=32 * 1024 * 1024,
        ),
    )(x_in, *packed)

    return out[:, :dout_last]


# ----------------------------------------------------------------------------
# Pure-JAX reference (same bf16-weight / f32-accumulate dataflow, full PyTorch
# semantics including the Linear bias before every BatchNorm).
# ----------------------------------------------------------------------------
def qnetwork_reference(x, params):
    h = x
    n = len(params)
    for i, layer in enumerate(params):
        w = layer["w"].astype(jnp.bfloat16)
        y = jnp.dot(h.astype(jnp.bfloat16), w,
                    preferred_element_type=jnp.float32) + layer["b"]
        if i < n - 1:
            mean = jnp.mean(y, axis=0, keepdims=True)
            c = y - mean
            var = jnp.mean(c * c, axis=0, keepdims=True)
            scale = layer["gamma"] * jax.lax.rsqrt(var + BN_EPS)
            h = jnp.maximum(c * scale + layer["beta"], 0.0)
        else:
            h = y
    return h


if __name__ == "__main__":
    base_dim = 64      # small version of the default 512
    batch = 8          # whole batch stays in one block (BN needs full batch)

    key = jax.random.PRNGKey(0)
    key, kx = jax.random.split(key)
    x = jax.random.normal(kx, (batch, base_dim * 4), jnp.float32)

    params = init_qnetwork_params(base_dim, key)
    packed, dims = pack_qnetwork_params(params)

    out = qnetwork_forward(x, packed, dims)
    out = jax.block_until_ready(out)

    ref = qnetwork_reference(x, params)
    assert out.shape == (batch, base_dim)
    assert jnp.allclose(out, ref, atol=5e-3, rtol=5e-3), "mismatch vs reference"

    print("KERNEL_OK")
</pallas_src>

<mosaic_0001>
module attributes {stable_mosaic.version = 11 : i64} {
  func.func @_qnet_fused_kernel(%arg0: i32, %arg1: memref<8x256xf32, #tpu.memory_space<vmem>>, %arg2: memref<256x128xbf16, #tpu.memory_space<vmem>>, %arg3: memref<2x128xf32, #tpu.memory_space<vmem>>, %arg4: memref<128x128xbf16, #tpu.memory_space<vmem>>, %arg5: memref<2x128xf32, #tpu.memory_space<vmem>>, %arg6: memref<128x128xbf16, #tpu.memory_space<vmem>>, %arg7: memref<2x128xf32, #tpu.memory_space<vmem>>, %arg8: memref<128x128xbf16, #tpu.memory_space<vmem>>, %arg9: memref<2x128xf32, #tpu.memory_space<vmem>>, %arg10: memref<128x128xbf16, #tpu.memory_space<vmem>>, %arg11: memref<2x128xf32, #tpu.memory_space<vmem>>, %arg12: memref<128x128xbf16, #tpu.memory_space<vmem>>, %arg13: memref<2x128xf32, #tpu.memory_space<vmem>>, %arg14: memref<128x128xbf16, #tpu.memory_space<vmem>>, %arg15: memref<2x128xf32, #tpu.memory_space<vmem>>, %arg16: memref<128x128xbf16, #tpu.memory_space<vmem>>, %arg17: memref<1x128xf32, #tpu.memory_space<vmem>>, %arg18: memref<8x128xf32, #tpu.memory_space<vmem>>) attributes {dimension_semantics = [#tpu.dimension_semantics<arbitrary>], iteration_bounds = array<i64: 1>, scalar_prefetch = 0 : i64, scratch_operands = 0 : i64, tpu.core_type = #tpu.core_type<tc>, window_params = [{pipeline_mode = #tpu.pipeline_mode<synchronous>, transform_indices = @transform_0, window_bounds = array<i64: 8, 256>}, {pipeline_mode = #tpu.pipeline_mode<synchronous>, transform_indices = @transform_1, window_bounds = array<i64: 256, 128>}, {pipeline_mode = #tpu.pipeline_mode<synchronous>, transform_indices = @transform_2, window_bounds = array<i64: 2, 128>}, {pipeline_mode = #tpu.pipeline_mode<synchronous>, transform_indices = @transform_3, window_bounds = array<i64: 128, 128>}, {pipeline_mode = #tpu.pipeline_mode<synchronous>, transform_indices = @transform_4, window_bounds = array<i64: 2, 128>}, {pipeline_mode = #tpu.pipeline_mode<synchronous>, transform_indices = @transform_5, window_bounds = array<i64: 128, 128>}, {pipeline_mode = #tpu.pipeline_mode<synchronous>, transform_indices = @transform_6, window_bounds = array<i64: 2, 128>}, {pipeline_mode = #tpu.pipeline_mode<synchronous>, transform_indices = @transform_7, window_bounds = array<i64: 128, 128>}, {pipeline_mode = #tpu.pipeline_mode<synchronous>, transform_indices = @transform_8, window_bounds = array<i64: 2, 128>}, {pipeline_mode = #tpu.pipeline_mode<synchronous>, transform_indices = @transform_9, window_bounds = array<i64: 128, 128>}, {pipeline_mode = #tpu.pipeline_mode<synchronous>, transform_indices = @transform_10, window_bounds = array<i64: 2, 128>}, {pipeline_mode = #tpu.pipeline_mode<synchronous>, transform_indices = @transform_11, window_bounds = array<i64: 128, 128>}, {pipeline_mode = #tpu.pipeline_mode<synchronous>, transform_indices = @transform_12, window_bounds = array<i64: 2, 128>}, {pipeline_mode = #tpu.pipeline_mode<synchronous>, transform_indices = @transform_13, window_bounds = array<i64: 128, 128>}, {pipeline_mode = #tpu.pipeline_mode<synchronous>, transform_indices = @transform_14, window_bounds = array<i64: 2, 128>}, {pipeline_mode = #tpu.pipeline_mode<synchronous>, transform_indices = @transform_15, window_bounds = array<i64: 128, 128>}, {pipeline_mode = #tpu.pipeline_mode<synchronous>, transform_indices = @transform_16, window_bounds = array<i64: 1, 128>}, {pipeline_mode = #tpu.pipeline_mode<synchronous>, transform_indices = @transform_17, window_bounds = array<i64: 8, 128>}]} {
    %c0 = arith.constant 0 : index
    %c0_0 = arith.constant 0 : index
    %0 = vector.load %arg1[%c0, %c0_0] : memref<8x256xf32, #tpu.memory_space<vmem>>, vector<8x256xf32>
    %c0_1 = arith.constant 0 : index
    %c0_2 = arith.constant 0 : index
    %1 = vector.load %arg2[%c0_1, %c0_2] : memref<256x128xbf16, #tpu.memory_space<vmem>>, vector<256x128xbf16>
    %c0_3 = arith.constant 0 : index
    %c0_4 = arith.constant 0 : index
    %2 = vector.load %arg3[%c0_3, %c0_4] : memref<2x128xf32, #tpu.memory_space<vmem>>, vector<2x128xf32>
    %3 = arith.truncf %0 : vector<8x256xf32> to vector<8x256xbf16>
    %cst = arith.constant dense<0.000000e+00> : vector<8x128xf32>
    %4 = tpu.matmul %3, %1, %cst {dimension_numbers = #tpu.dot_dimension_numbers<[1], [0], [0], [1], [0, 0, 1, 1], [], []>} : vector<8x256xbf16>, vector<256x128xbf16>, vector<8x128xf32> -> vector<8x128xf32>
    %5 = vector.extract_strided_slice %2 {offsets = [0, 0], sizes = [1, 128], strides = [1, 1]} : vector<2x128xf32> to vector<1x128xf32>
    %6 = vector.extract_strided_slice %2 {offsets = [1, 0], sizes = [1, 128], strides = [1, 1]} : vector<2x128xf32> to vector<1x128xf32>
    %cst_5 = arith.constant dense<0.000000e+00> : vector<128xf32>
    %7 = vector.multi_reduction <add>, %4, %cst_5 [0] : vector<8x128xf32> to vector<128xf32>
    %8 = vector.shape_cast %7 : vector<128xf32> to vector<1x128xf32>
    %cst_6 = arith.constant 8.000000e+00 : f32
    %9 = vector.broadcast %cst_6 : f32 to vector<1x128xf32>
    %10 = arith.divf %8, %9 : vector<1x128xf32>
    %11 = vector.broadcast %10 : vector<1x128xf32> to vector<8x128xf32>
    %12 = arith.subf %4, %11 : vector<8x128xf32>
    %13 = arith.mulf %12, %12 : vector<8x128xf32>
    %cst_7 = arith.constant dense<0.000000e+00> : vector<128xf32>
    %14 = vector.multi_reduction <add>, %13, %cst_7 [0] : vector<8x128xf32> to vector<128xf32>
    %15 = vector.shape_cast %14 : vector<128xf32> to vector<1x128xf32>
    %cst_8 = arith.constant 8.000000e+00 : f32
    %16 = vector.broadcast %cst_8 : f32 to vector<1x128xf32>
    %17 = arith.divf %15, %16 : vector<1x128xf32>
    %cst_9 = arith.constant 9.99999974E-6 : f32
    %18 = vector.broadcast %cst_9 : f32 to vector<1x128xf32>
    %19 = arith.addf %17, %18 : vector<1x128xf32>
    %20 = math.rsqrt %19 : vector<1x128xf32>
    %21 = arith.mulf %5, %20 : vector<1x128xf32>
    %22 = vector.broadcast %21 : vector<1x128xf32> to vector<8x128xf32>
    %23 = arith.mulf %12, %22 : vector<8x128xf32>
    %24 = vector.broadcast %6 : vector<1x128xf32> to vector<8x128xf32>
    %25 = arith.addf %23, %24 : vector<8x128xf32>
    %cst_10 = arith.constant 0.000000e+00 : f32
    %26 = vector.broadcast %cst_10 : f32 to vector<8x128xf32>
    %27 = arith.maximumf %25, %26 : vector<8x128xf32>
    %c0_11 = arith.constant 0 : index
    %c0_12 = arith.constant 0 : index
    %28 = vector.load %arg4[%c0_11, %c0_12] : memref<128x128xbf16, #tpu.memory_space<vmem>>, vector<128x128xbf16>
    %c0_13 = arith.constant 0 : index
    %c0_14 = arith.constant 0 : index
    %29 = vector.load %arg5[%c0_13, %c0_14] : memref<2x128xf32, #tpu.memory_space<vmem>>, vector<2x128xf32>
    %30 = arith.truncf %27 : vector<8x128xf32> to vector<8x128xbf16>
    %cst_15 = arith.constant dense<0.000000e+00> : vector<8x128xf32>
    %31 = tpu.matmul %30, %28, %cst_15 {dimension_numbers = #tpu.dot_dimension_numbers<[1], [0], [0], [1], [0, 0, 1, 1], [], []>} : vector<8x128xbf16>, vector<128x128xbf16>, vector<8x128xf32> -> vector<8x128xf32>
    %32 = vector.extract_strided_slice %29 {offsets = [0, 0], sizes = [1, 128], strides = [1, 1]} : vector<2x128xf32> to vector<1x128xf32>
    %33 = vector.extract_strided_slice %29 {offsets = [1, 0], sizes = [1, 128], strides = [1, 1]} : vector<2x128xf32> to vector<1x128xf32>
    %cst_16 = arith.constant dense<0.000000e+00> : vector<128xf32>
    %34 = vector.multi_reduction <add>, %31, %cst_16 [0] : vector<8x128xf32> to vector<128xf32>
    %35 = vector.shape_cast %34 : vector<128xf32> to vector<1x128xf32>
    %cst_17 = arith.constant 8.000000e+00 : f32
    %36 = vector.broadcast %cst_17 : f32 to vector<1x128xf32>
    %37 = arith.divf %35, %36 : vector<1x128xf32>
    %38 = vector.broadcast %37 : vector<1x128xf32> to vector<8x128xf32>
    %39 = arith.subf %31, %38 : vector<8x128xf32>
    %40 = arith.mulf %39, %39 : vector<8x128xf32>
    %cst_18 = arith.constant dense<0.000000e+00> : vector<128xf32>
    %41 = vector.multi_reduction <add>, %40, %cst_18 [0] : vector<8x128xf32> to vector<128xf32>
    %42 = vector.shape_cast %41 : vector<128xf32> to vector<1x128xf32>
    %cst_19 = arith.constant 8.000000e+00 : f32
    %43 = vector.broadcast %cst_19 : f32 to vector<1x128xf32>
    %44 = arith.divf %42, %43 : vector<1x128xf32>
    %cst_20 = arith.constant 9.99999974E-6 : f32
    %45 = vector.broadcast %cst_20 : f32 to vector<1x128xf32>
    %46 = arith.addf %44, %45 : vector<1x128xf32>
    %47 = math.rsqrt %46 : vector<1x128xf32>
    %48 = arith.mulf %32, %47 : vector<1x128xf32>
    %49 = vector.broadcast %48 : vector<1x128xf32> to vector<8x128xf32>
    %50 = arith.mulf %39, %49 : vector<8x128xf32>
    %51 = vector.broadcast %33 : vector<1x128xf32> to vector<8x128xf32>
    %52 = arith.addf %50, %51 : vector<8x128xf32>
    %cst_21 = arith.constant 0.000000e+00 : f32
    %53 = vector.broadcast %cst_21 : f32 to vector<8x128xf32>
    %54 = arith.maximumf %52, %53 : vector<8x128xf32>
    %c0_22 = arith.constant 0 : index
    %c0_23 = arith.constant 0 : index
    %55 = vector.load %arg6[%c0_22, %c0_23] : memref<128x128xbf16, #tpu.memory_space<vmem>>, vector<128x128xbf16>
    %c0_24 = arith.constant 0 : index
    %c0_25 = arith.constant 0 : index
    %56 = vector.load %arg7[%c0_24, %c0_25] : memref<2x128xf32, #tpu.memory_space<vmem>>, vector<2x128xf32>
    %57 = arith.truncf %54 : vector<8x128xf32> to vector<8x128xbf16>
    %cst_26 = arith.constant dense<0.000000e+00> : vector<8x128xf32>
    %58 = tpu.matmul %57, %55, %cst_26 {dimension_numbers = #tpu.dot_dimension_numbers<[1], [0], [0], [1], [0, 0, 1, 1], [], []>} : vector<8x128xbf16>, vector<128x128xbf16>, vector<8x128xf32> -> vector<8x128xf32>
    %59 = vector.extract_strided_slice %56 {offsets = [0, 0], sizes = [1, 128], strides = [1, 1]} : vector<2x128xf32> to vector<1x128xf32>
    %60 = vector.extract_strided_slice %56 {offsets = [1, 0], sizes = [1, 128], strides = [1, 1]} : vector<2x128xf32> to vector<1x128xf32>
    %cst_27 = arith.constant dense<0.000000e+00> : vector<128xf32>
    %61 = vector.multi_reduction <add>, %58, %cst_27 [0] : vector<8x128xf32> to vector<128xf32>
    %62 = vector.shape_cast %61 : vector<128xf32> to vector<1x128xf32>
    %cst_28 = arith.constant 8.000000e+00 : f32
    %63 = vector.broadcast %cst_28 : f32 to vector<1x128xf32>
    %64 = arith.divf %62, %63 : vector<1x128xf32>
    %65 = vector.broadcast %64 : vector<1x128xf32> to vector<8x128xf32>
    %66 = arith.subf %58, %65 : vector<8x128xf32>
    %67 = arith.mulf %66, %66 : vector<8x128xf32>
    %cst_29 = arith.constant dense<0.000000e+00> : vector<128xf32>
    %68 = vector.multi_reduction <add>, %67, %cst_29 [0] : vector<8x128xf32> to vector<128xf32>
    %69 = vector.shape_cast %68 : vector<128xf32> to vector<1x128xf32>
    %cst_30 = arith.constant 8.000000e+00 : f32
    %70 = vector.broadcast %cst_30 : f32 to vector<1x128xf32>
    %71 = arith.divf %69, %70 : vector<1x128xf32>
    %cst_31 = arith.constant 9.99999974E-6 : f32
    %72 = vector.broadcast %cst_31 : f32 to vector<1x128xf32>
    %73 = arith.addf %71, %72 : vector<1x128xf32>
    %74 = math.rsqrt %73 : vector<1x128xf32>
    %75 = arith.mulf %59, %74 : vector<1x128xf32>
    %76 = vector.broadcast %75 : vector<1x128xf32> to vector<8x128xf32>
    %77 = arith.mulf %66, %76 : vector<8x128xf32>
    %78 = vector.broadcast %60 : vector<1x128xf32> to vector<8x128xf32>
    %79 = arith.addf %77, %78 : vector<8x128xf32>
    %cst_32 = arith.constant 0.000000e+00 : f32
    %80 = vector.broadcast %cst_32 : f32 to vector<8x128xf32>
    %81 = arith.maximumf %79, %80 : vector<8x128xf32>
    %c0_33 = arith.constant 0 : index
    %c0_34 = arith.constant 0 : index
    %82 = vector.load %arg8[%c0_33, %c0_34] : memref<128x128xbf16, #tpu.memory_space<vmem>>, vector<128x128xbf16>
    %c0_35 = arith.constant 0 : index
    %c0_36 = arith.constant 0 : index
    %83 = vector.load %arg9[%c0_35, %c0_36] : memref<2x128xf32, #tpu.memory_space<vmem>>, vector<2x128xf32>
    %84 = arith.truncf %81 : vector<8x128xf32> to vector<8x128xbf16>
    %cst_37 = arith.constant dense<0.000000e+00> : vector<8x128xf32>
    %85 = tpu.matmul %84, %82, %cst_37 {dimension_numbers = #tpu.dot_dimension_numbers<[1], [0], [0], [1], [0, 0, 1, 1], [], []>} : vector<8x128xbf16>, vector<128x128xbf16>, vector<8x128xf32> -> vector<8x128xf32>
    %86 = vector.extract_strided_slice %83 {offsets = [0, 0], sizes = [1, 128], strides = [1, 1]} : vector<2x128xf32> to vector<1x128xf32>
    %87 = vector.extract_strided_slice %83 {offsets = [1, 0], sizes = [1, 128], strides = [1, 1]} : vector<2x128xf32> to vector<1x128xf32>
    %cst_38 = arith.constant dense<0.000000e+00> : vector<128xf32>
    %88 = vector.multi_reduction <add>, %85, %cst_38 [0] : vector<8x128xf32> to vector<128xf32>
    %89 = vector.shape_cast %88 : vector<128xf32> to vector<1x128xf32>
    %cst_39 = arith.constant 8.000000e+00 : f32
    %90 = vector.broadcast %cst_39 : f32 to vector<1x128xf32>
    %91 = arith.divf %89, %90 : vector<1x128xf32>
    %92 = vector.broadcast %91 : vector<1x128xf32> to vector<8x128xf32>
    %93 = arith.subf %85, %92 : vector<8x128xf32>
    %94 = arith.mulf %93, %93 : vector<8x128xf32>
    %cst_40 = arith.constant dense<0.000000e+00> : vector<128xf32>
    %95 = vector.multi_reduction <add>, %94, %cst_40 [0] : vector<8x128xf32> to vector<128xf32>
    %96 = vector.shape_cast %95 : vector<128xf32> to vector<1x128xf32>
    %cst_41 = arith.constant 8.000000e+00 : f32
    %97 = vector.broadcast %cst_41 : f32 to vector<1x128xf32>
    %98 = arith.divf %96, %97 : vector<1x128xf32>
    %cst_42 = arith.constant 9.99999974E-6 : f32
    %99 = vector.broadcast %cst_42 : f32 to vector<1x128xf32>
    %100 = arith.addf %98, %99 : vector<1x128xf32>
    %101 = math.rsqrt %100 : vector<1x128xf32>
    %102 = arith.mulf %86, %101 : vector<1x128xf32>
    %103 = vector.broadcast %102 : vector<1x128xf32> to vector<8x128xf32>
    %104 = arith.mulf %93, %103 : vector<8x128xf32>
    %105 = vector.broadcast %87 : vector<1x128xf32> to vector<8x128xf32>
    %106 = arith.addf %104, %105 : vector<8x128xf32>
    %cst_43 = arith.constant 0.000000e+00 : f32
    %107 = vector.broadcast %cst_43 : f32 to vector<8x128xf32>
    %108 = arith.maximumf %106, %107 : vector<8x128xf32>
    %c0_44 = arith.constant 0 : index
    %c0_45 = arith.constant 0 : index
    %109 = vector.load %arg10[%c0_44, %c0_45] : memref<128x128xbf16, #tpu.memory_space<vmem>>, vector<128x128xbf16>
    %c0_46 = arith.constant 0 : index
    %c0_47 = arith.constant 0 : index
    %110 = vector.load %arg11[%c0_46, %c0_47] : memref<2x128xf32, #tpu.memory_space<vmem>>, vector<2x128xf32>
    %111 = arith.truncf %108 : vector<8x128xf32> to vector<8x128xbf16>
    %cst_48 = arith.constant dense<0.000000e+00> : vector<8x128xf32>
    %112 = tpu.matmul %111, %109, %cst_48 {dimension_numbers = #tpu.dot_dimension_numbers<[1], [0], [0], [1], [0, 0, 1, 1], [], []>} : vector<8x128xbf16>, vector<128x128xbf16>, vector<8x128xf32> -> vector<8x128xf32>
    %113 = vector.extract_strided_slice %110 {offsets = [0, 0], sizes = [1, 128], strides = [1, 1]} : vector<2x128xf32> to vector<1x128xf32>
    %114 = vector.extract_strided_slice %110 {offsets = [1, 0], sizes = [1, 128], strides = [1, 1]} : vector<2x128xf32> to vector<1x128xf32>
    %cst_49 = arith.constant dense<0.000000e+00> : vector<128xf32>
    %115 = vector.multi_reduction <add>, %112, %cst_49 [0] : vector<8x128xf32> to vector<128xf32>
    %116 = vector.shape_cast %115 : vector<128xf32> to vector<1x128xf32>
    %cst_50 = arith.constant 8.000000e+00 : f32
    %117 = vector.broadcast %cst_50 : f32 to vector<1x128xf32>
    %118 = arith.divf %116, %117 : vector<1x128xf32>
    %119 = vector.broadcast %118 : vector<1x128xf32> to vector<8x128xf32>
    %120 = arith.subf %112, %119 : vector<8x128xf32>
    %121 = arith.mulf %120, %120 : vector<8x128xf32>
    %cst_51 = arith.constant dense<0.000000e+00> : vector<128xf32>
    %122 = vector.multi_reduction <add>, %121, %cst_51 [0] : vector<8x128xf32> to vector<128xf32>
    %123 = vector.shape_cast %122 : vector<128xf32> to vector<1x128xf32>
    %cst_52 = arith.constant 8.000000e+00 : f32
    %124 = vector.broadcast %cst_52 : f32 to vector<1x128xf32>
    %125 = arith.divf %123, %124 : vector<1x128xf32>
    %cst_53 = arith.constant 9.99999974E-6 : f32
    %126 = vector.broadcast %cst_53 : f32 to vector<1x128xf32>
    %127 = arith.addf %125, %126 : vector<1x128xf32>
    %128 = math.rsqrt %127 : vector<1x128xf32>
    %129 = arith.mulf %113, %128 : vector<1x128xf32>
    %130 = vector.broadcast %129 : vector<1x128xf32> to vector<8x128xf32>
    %131 = arith.mulf %120, %130 : vector<8x128xf32>
    %132 = vector.broadcast %114 : vector<1x128xf32> to vector<8x128xf32>
    %133 = arith.addf %131, %132 : vector<8x128xf32>
    %cst_54 = arith.constant 0.000000e+00 : f32
    %134 = vector.broadcast %cst_54 : f32 to vector<8x128xf32>
    %135 = arith.maximumf %133, %134 : vector<8x128xf32>
    %c0_55 = arith.constant 0 : index
    %c0_56 = arith.constant 0 : index
    %136 = vector.load %arg12[%c0_55, %c0_56] : memref<128x128xbf16, #tpu.memory_space<vmem>>, vector<128x128xbf16>
    %c0_57 = arith.constant 0 : index
    %c0_58 = arith.constant 0 : index
    %137 = vector.load %arg13[%c0_57, %c0_58] : memref<2x128xf32, #tpu.memory_space<vmem>>, vector<2x128xf32>
    %138 = arith.truncf %135 : vector<8x128xf32> to vector<8x128xbf16>
    %cst_59 = arith.constant dense<0.000000e+00> : vector<8x128xf32>
    %139 = tpu.matmul %138, %136, %cst_59 {dimension_numbers = #tpu.dot_dimension_numbers<[1], [0], [0], [1], [0, 0, 1, 1], [], []>} : vector<8x128xbf16>, vector<128x128xbf16>, vector<8x128xf32> -> vector<8x128xf32>
    %140 = vector.extract_strided_slice %137 {offsets = [0, 0], sizes = [1, 128], strides = [1, 1]} : vector<2x128xf32> to vector<1x128xf32>
    %141 = vector.extract_strided_slice %137 {offsets = [1, 0], sizes = [1, 128], strides = [1, 1]} : vector<2x128xf32> to vector<1x128xf32>
    %cst_60 = arith.constant dense<0.000000e+00> : vector<128xf32>
    %142 = vector.multi_reduction <add>, %139, %cst_60 [0] : vector<8x128xf32> to vector<128xf32>
    %143 = vector.shape_cast %142 : vector<128xf32> to vector<1x128xf32>
    %cst_61 = arith.constant 8.000000e+00 : f32
    %144 = vector.broadcast %cst_61 : f32 to vector<1x128xf32>
    %145 = arith.divf %143, %144 : vector<1x128xf32>
    %146 = vector.broadcast %145 : vector<1x128xf32> to vector<8x128xf32>
    %147 = arith.subf %139, %146 : vector<8x128xf32>
    %148 = arith.mulf %147, %147 : vector<8x128xf32>
    %cst_62 = arith.constant dense<0.000000e+00> : vector<128xf32>
    %149 = vector.multi_reduction <add>, %148, %cst_62 [0] : vector<8x128xf32> to vector<128xf32>
    %150 = vector.shape_cast %149 : vector<128xf32> to vector<1x128xf32>
    %cst_63 = arith.constant 8.000000e+00 : f32
    %151 = vector.broadcast %cst_63 : f32 to vector<1x128xf32>
    %152 = arith.divf %150, %151 : vector<1x128xf32>
    %cst_64 = arith.constant 9.99999974E-6 : f32
    %153 = vector.broadcast %cst_64 : f32 to vector<1x128xf32>
    %154 = arith.addf %152, %153 : vector<1x128xf32>
    %155 = math.rsqrt %154 : vector<1x128xf32>
    %156 = arith.mulf %140, %155 : vector<1x128xf32>
    %157 = vector.broadcast %156 : vector<1x128xf32> to vector<8x128xf32>
    %158 = arith.mulf %147, %157 : vector<8x128xf32>
    %159 = vector.broadcast %141 : vector<1x128xf32> to vector<8x128xf32>
    %160 = arith.addf %158, %159 : vector<8x128xf32>
    %cst_65 = arith.constant 0.000000e+00 : f32
    %161 = vector.broadcast %cst_65 : f32 to vector<8x128xf32>
    %162 = arith.maximumf %160, %161 : vector<8x128xf32>
    %c0_66 = arith.constant 0 : index
    %c0_67 = arith.constant 0 : index
    %163 = vector.load %arg14[%c0_66, %c0_67] : memref<128x128xbf16, #tpu.memory_space<vmem>>, vector<128x128xbf16>
    %c0_68 = arith.constant 0 : index
    %c0_69 = arith.constant 0 : index
    %164 = vector.load %arg15[%c0_68, %c0_69] : memref<2x128xf32, #tpu.memory_space<vmem>>, vector<2x128xf32>
    %165 = arith.truncf %162 : vector<8x128xf32> to vector<8x128xbf16>
    %cst_70 = arith.constant dense<0.000000e+00> : vector<8x128xf32>
    %166 = tpu.matmul %165, %163, %cst_70 {dimension_numbers = #tpu.dot_dimension_numbers<[1], [0], [0], [1], [0, 0, 1, 1], [], []>} : vector<8x128xbf16>, vector<128x128xbf16>, vector<8x128xf32> -> vector<8x128xf32>
    %167 = vector.extract_strided_slice %164 {offsets = [0, 0], sizes = [1, 128], strides = [1, 1]} : vector<2x128xf32> to vector<1x128xf32>
    %168 = vector.extract_strided_slice %164 {offsets = [1, 0], sizes = [1, 128], strides = [1, 1]} : vector<2x128xf32> to vector<1x128xf32>
    %cst_71 = arith.constant dense<0.000000e+00> : vector<128xf32>
    %169 = vector.multi_reduction <add>, %166, %cst_71 [0] : vector<8x128xf32> to vector<128xf32>
    %170 = vector.shape_cast %169 : vector<128xf32> to vector<1x128xf32>
    %cst_72 = arith.constant 8.000000e+00 : f32
    %171 = vector.broadcast %cst_72 : f32 to vector<1x128xf32>
    %172 = arith.divf %170, %171 : vector<1x128xf32>
    %173 = vector.broadcast %172 : vector<1x128xf32> to vector<8x128xf32>
    %174 = arith.subf %166, %173 : vector<8x128xf32>
    %175 = arith.mulf %174, %174 : vector<8x128xf32>
    %cst_73 = arith.constant dense<0.000000e+00> : vector<128xf32>
    %176 = vector.multi_reduction <add>, %175, %cst_73 [0] : vector<8x128xf32> to vector<128xf32>
    %177 = vector.shape_cast %176 : vector<128xf32> to vector<1x128xf32>
    %cst_74 = arith.constant 8.000000e+00 : f32
    %178 = vector.broadcast %cst_74 : f32 to vector<1x128xf32>
    %179 = arith.divf %177, %178 : vector<1x128xf32>
    %cst_75 = arith.constant 9.99999974E-6 : f32
    %180 = vector.broadcast %cst_75 : f32 to vector<1x128xf32>
    %181 = arith.addf %179, %180 : vector<1x128xf32>
    %182 = math.rsqrt %181 : vector<1x128xf32>
    %183 = arith.mulf %167, %182 : vector<1x128xf32>
    %184 = vector.broadcast %183 : vector<1x128xf32> to vector<8x128xf32>
    %185 = arith.mulf %174, %184 : vector<8x128xf32>
    %186 = vector.broadcast %168 : vector<1x128xf32> to vector<8x128xf32>
    %187 = arith.addf %185, %186 : vector<8x128xf32>
    %cst_76 = arith.constant 0.000000e+00 : f32
    %188 = vector.broadcast %cst_76 : f32 to vector<8x128xf32>
    %189 = arith.maximumf %187, %188 : vector<8x128xf32>
    %c0_77 = arith.constant 0 : index
    %c0_78 = arith.constant 0 : index
    %190 = vector.load %arg16[%c0_77, %c0_78] : memref<128x128xbf16, #tpu.memory_space<vmem>>, vector<128x128xbf16>
    %c0_79 = arith.constant 0 : index
    %c0_80 = arith.constant 0 : index
    %191 = vector.load %arg17[%c0_79, %c0_80] : memref<1x128xf32, #tpu.memory_space<vmem>>, vector<1x128xf32>
    %192 = arith.truncf %189 : vector<8x128xf32> to vector<8x128xbf16>
    %cst_81 = arith.constant dense<0.000000e+00> : vector<8x128xf32>
    %193 = tpu.matmul %192, %190, %cst_81 {dimension_numbers = #tpu.dot_dimension_numbers<[1], [0], [0], [1], [0, 0, 1, 1], [], []>} : vector<8x128xbf16>, vector<128x128xbf16>, vector<8x128xf32> -> vector<8x128xf32>
    %194 = vector.broadcast %191 : vector<1x128xf32> to vector<8x128xf32>
    %195 = arith.addf %193, %194 : vector<8x128xf32>
    %c0_82 = arith.constant 0 : index
    %c0_83 = arith.constant 0 : index
    %196 = vector.load %arg18[%c0_82, %c0_83] : memref<8x128xf32, #tpu.memory_space<vmem>>, vector<8x128xf32>
    tpu.vector_store %arg18[%c0_82, %c0_83], %195 {strides = array<i32>} : memref<8x128xf32, #tpu.memory_space<vmem>>, vector<8x128xf32>,
    return
  }
  func.func @transform_0(%arg0: i32) -> (i32, i32) {
    %c0_i32 = arith.constant 0 : i32
    %c0_i32_0 = arith.constant 0 : i32
    %c0_i32_1 = arith.constant 0 : i32
    return %c0_i32, %c0_i32_0 : i32, i32
  }
  func.func @transform_1(%arg0: i32) -> (i32, i32) {
    %c0_i32 = arith.constant 0 : i32
    %c0_i32_0 = arith.constant 0 : i32
    %c0_i32_1 = arith.constant 0 : i32
    return %c0_i32, %c0_i32_0 : i32, i32
  }
  func.func @transform_2(%arg0: i32) -> (i32, i32) {
    %c0_i32 = arith.constant 0 : i32
    %c0_i32_0 = arith.constant 0 : i32
    %c0_i32_1 = arith.constant 0 : i32
    return %c0_i32, %c0_i32_0 : i32, i32
  }
  func.func @transform_3(%arg0: i32) -> (i32, i32) {
    %c0_i32 = arith.constant 0 : i32
    %c0_i32_0 = arith.constant 0 : i32
    %c0_i32_1 = arith.constant 0 : i32
    return %c0_i32, %c0_i32_0 : i32, i32
  }
  func.func @transform_4(%arg0: i32) -> (i32, i32) {
    %c0_i32 = arith.constant 0 : i32
    %c0_i32_0 = arith.constant 0 : i32
    %c0_i32_1 = arith.constant 0 : i32
    return %c0_i32, %c0_i32_0 : i32, i32
  }
  func.func @transform_5(%arg0: i32) -> (i32, i32) {
    %c0_i32 = arith.constant 0 : i32
    %c0_i32_0 = arith.constant 0 : i32
    %c0_i32_1 = arith.constant 0 : i32
    return %c0_i32, %c0_i32_0 : i32, i32
  }
  func.func @transform_6(%arg0: i32) -> (i32, i32) {
    %c0_i32 = arith.constant 0 : i32
    %c0_i32_0 = arith.constant 0 : i32
    %c0_i32_1 = arith.constant 0 : i32
    return %c0_i32, %c0_i32_0 : i32, i32
  }
  func.func @transform_7(%arg0: i32) -> (i32, i32) {
    %c0_i32 = arith.constant 0 : i32
    %c0_i32_0 = arith.constant 0 : i32
    %c0_i32_1 = arith.constant 0 : i32
    return %c0_i32, %c0_i32_0 : i32, i32
  }
  func.func @transform_8(%arg0: i32) -> (i32, i32) {
    %c0_i32 = arith.constant 0 : i32
    %c0_i32_0 = arith.constant 0 : i32
    %c0_i32_1 = arith.constant 0 : i32
    return %c0_i32, %c0_i32_0 : i32, i32
  }
  func.func @transform_9(%arg0: i32) -> (i32, i32) {
    %c0_i32 = arith.constant 0 : i32
    %c0_i32_0 = arith.constant 0 : i32
    %c0_i32_1 = arith.constant 0 : i32
    return %c0_i32, %c0_i32_0 : i32, i32
  }
  func.func @transform_10(%arg0: i32) -> (i32, i32) {
    %c0_i32 = arith.constant 0 : i32
    %c0_i32_0 = arith.constant 0 : i32
    %c0_i32_1 = arith.constant 0 : i32
    return %c0_i32, %c0_i32_0 : i32, i32
  }
  func.func @transform_11(%arg0: i32) -> (i32, i32) {
    %c0_i32 = arith.constant 0 : i32
    %c0_i32_0 = arith.constant 0 : i32
    %c0_i32_1 = arith.constant 0 : i32
    return %c0_i32, %c0_i32_0 : i32, i32
  }
  func.func @transform_12(%arg0: i32) -> (i32, i32) {
    %c0_i32 = arith.constant 0 : i32
    %c0_i32_0 = arith.constant 0 : i32
    %c0_i32_1 = arith.constant 0 : i32
    return %c0_i32, %c0_i32_0 : i32, i32
  }
  func.func @transform_13(%arg0: i32) -> (i32, i32) {
    %c0_i32 = arith.constant 0 : i32
    %c0_i32_0 = arith.constant 0 : i32
    %c0_i32_1 = arith.constant 0 : i32
    return %c0_i32, %c0_i32_0 : i32, i32
  }
  func.func @transform_14(%arg0: i32) -> (i32, i32) {
    %c0_i32 = arith.constant 0 : i32
    %c0_i32_0 = arith.constant 0 : i32
    %c0_i32_1 = arith.constant 0 : i32
    return %c0_i32, %c0_i32_0 : i32, i32
  }
  func.func @transform_15(%arg0: i32) -> (i32, i32) {
    %c0_i32 = arith.constant 0 : i32
    %c0_i32_0 = arith.constant 0 : i32
    %c0_i32_1 = arith.constant 0 : i32
    return %c0_i32, %c0_i32_0 : i32, i32
  }
  func.func @transform_16(%arg0: i32) -> (i32, i32) {
    %c0_i32 = arith.constant 0 : i32
    %c0_i32_0 = arith.constant 0 : i32
    %c0_i32_1 = arith.constant 0 : i32
    return %c0_i32, %c0_i32_0 : i32, i32
  }
  func.func @transform_17(%arg0: i32) -> (i32, i32) {
    %c0_i32 = arith.constant 0 : i32
    %c0_i32_0 = arith.constant 0 : i32
    %c0_i32_1 = arith.constant 0 : i32
    return %c0_i32, %c0_i32_0 : i32, i32
  }
}

</mosaic_0001>

<bundles_post_ra>
// kernel: qnetwork_forward.1
= control target key start
LH: loop header
LB: loop body
LE: loop exit
PB: predicated region body
PF: predicated region fallthrough
CT: control target
= control target key end

     0   :  { %s2320_s0 = inlined_call_operand.hbm [shape: f32[8,256], index: 0, kind: input, shape index: {}]   ;;  %s2321_s1 = inlined_call_operand.hbm [shape: bf16[256,128], index: 1, kind: input, shape index: {}]   ;;  %s2322_s2 = inlined_call_operand.vmem [shape: f32[2,128], index: 2, kind: input, shape index: {}]   ;;  %s2323_s3 = inlined_call_operand.hbm [shape: bf16[128,128], index: 3, kind: input, shape index: {}]   ;;  %s2324_s4 = inlined_call_operand.vmem [shape: f32[2,128], index: 4, kind: input, shape index: {}]   ;;  %s2325_s5 = inlined_call_operand.hbm [shape: bf16[128,128], index: 5, kind: input, shape index: {}]   ;;  %s2326_s6 = inlined_call_operand.vmem [shape: f32[2,128], index: 6, kind: input, shape index: {}]   ;;  %s2327_s7 = inlined_call_operand.hbm [shape: bf16[128,128], index: 7, kind: input, shape index: {}]   ;;  %s2328_s8 = inlined_call_operand.vmem [shape: f32[2,128], index: 8, kind: input, shape index: {}]   ;;  %s2329_s9 = inlined_call_operand.hbm [shape: bf16[128,128], index: 9, kind: input, shape index: {}]   ;;  %s2330_s10 = inlined_call_operand.vmem [shape: f32[2,128], index: 10, kind: input, shape index: {}]   ;;  %s2331_s11 = inlined_call_operand.hbm [shape: bf16[128,128], index: 11, kind: input, shape index: {}]   ;;  %s2332_s12 = inlined_call_operand.vmem [shape: f32[2,128], index: 12, kind: input, shape index: {}]   ;;  %s2333_s13 = inlined_call_operand.hbm [shape: bf16[128,128], index: 13, kind: input, shape index: {}]   ;;  %s2334_s14 = inlined_call_operand.vmem [shape: f32[2,128], index: 14, kind: input, shape index: {}]   ;;  %s2335_s15 = inlined_call_operand.hbm [shape: bf16[128,128], index: 15, kind: input, shape index: {}]   ;;  %s2336_s16 = inlined_call_operand.vmem [shape: f32[1,128], index: 16, kind: input, shape index: {}]   ;;  %s2337_s17 = inlined_call_operand.hbm [shape: f32[8,128], index: 17, kind: output, shape index: {}]  }
   0x1   :  { %2341 = sst [smem:[#allocation24_spill]] %s2320_s0 }
   0x2   :  { %2342 = sst [smem:[#allocation25_spill]] %s2321_s1 }
   0x3   :  { %2343 = sst [smem:[#allocation26_spill]] %s2336_s16 }
   0x4   :  { %2344 = sst [smem:[#allocation27_spill]] %s2337_s17 }
   0x5   :  { %22 = vsyncpa [#allocation3], 0 }
   0x6   :  { %23 = vsyncpa [#allocation6], 0 }
   0x7   :  { %24 = vsyncpa [#allocation9], 0 }
   0x8   :  { %25 = vsyncpa [#allocation12], 0 }
   0x9   :  { %26 = vsyncpa [#allocation15], 0 }
   0xa   :  { %27 = vsyncpa [#allocation4], 0  ;;  %s1960_s24 = smov [#allocation5]   ;;  %s2345_s28 = sld [smem:[#allocation25_spill]] }
   0xb   :  { %s43_s25 = sshll.u32 %s1960_s24, 4  ;;  %s44_s25 = int_to_ptr.vmem [resolvable:$true] %s43_s25 }
  0x10   :  { %s1728_s29 = scalar_lea.hbm %s2345_s28, 2048 }
  0x11   :  { %p1729_p0 = scmp.ne.s32.totalorder %s2345_s28, %s1728_s29  ;;  %p1732_p1 = scmp.lt.u32.totalorder %s1728_s29, %s2345_s28 }
  0x13   :  { %p1734_p2 = pnand %p1732_p1, %p1729_p0 }
  0x15   :  { %1737 = shalt.err (!%p1734_p2)
}
  0x16   :  { %s1738_s1 = scalar_lea.vmem %s44_s25, 2048  ;;  %p1743_p4 = scmp.lt.s32.totalorder %s44_s25, %s44_s25 }
  0x17   :  { %p1739_p3 = scmp.ne.s32.totalorder %s44_s25, %s1738_s1  ;;  %p1744_p5 = scmp.lt.s32.totalorder %s1738_s1, %s1738_s1 }
  0x19   :  { %p1745_p6 = por %p1744_p5, %p1743_p4 }
  0x1b   :  { %p1746_p7 = pnand %p1745_p6, %p1739_p3 }
  0x1d   :  { %1749 = shalt.err (!%p1746_p7)
}
  0x1e   :  { %s1961_s20 = smov 64   ;;  %s1962_s21 = smov 4  }
  0x1f   :  { %49 = dma.hbm_to_vmem [thread:$0]  %s2345_s28, 2048, %s44_s25, [#allocation6], %s1961_s20, %s1961_s20, %s1962_s21  }
  0x20   :  { %s1963_s24 = smov [#allocation8]   ;;  %s1964_s27 = smov [#allocation11]  }
  0x21   :  { %s71_s26 = sshll.u32 %s1963_s24, 4  ;;  %s99_s29 = sshll.u32 %s1964_s27, 4  ;;  %s72_s26 = int_to_ptr.vmem [resolvable:$true] %s71_s26  ;;  %s100_s29 = int_to_ptr.vmem [resolvable:$true] %s99_s29 }
  0x22   :  { %s1750_s18 = scalar_lea.hbm %s2325_s5, 1024 }
  0x23   :  { %p1751_p8 = scmp.ne.s32.totalorder %s2325_s5, %s1750_s18  ;;  %p1754_p9 = scmp.lt.u32.totalorder %s1750_s18, %s2325_s5 }
  0x25   :  { %p1756_p10 = pnand %p1754_p9, %p1751_p8 }
  0x27   :  { %1759 = shalt.err (!%p1756_p10)
}
  0x28   :  { %s1760_s25 = scalar_lea.vmem %s72_s26, 1024  ;;  %p1765_p12 = scmp.lt.s32.totalorder %s72_s26, %s72_s26 }
  0x29   :  { %p1761_p11 = scmp.ne.s32.totalorder %s72_s26, %s1760_s25  ;;  %p1766_p13 = scmp.lt.s32.totalorder %s1760_s25, %s1760_s25 }
  0x2b   :  { %p1767_p0 = por %p1766_p13, %p1765_p12 }
  0x2d   :  { %p1768_p1 = pnand %p1767_p0, %p1761_p11 }
  0x2f   :  { %1771 = shalt.err (!%p1768_p1)
}
  0x30   :  { %77 = dma.hbm_to_vmem [thread:$0]  %s2325_s5, 1024, %s72_s26, [#allocation9], %s1961_s20, %s1961_s20, %s1962_s21  }
  0x31   :  { %s1772_s17 = scalar_lea.hbm %s2329_s9, 1024 }
  0x32   :  { %p1773_p2 = scmp.ne.s32.totalorder %s2329_s9, %s1772_s17  ;;  %p1776_p3 = scmp.lt.u32.totalorder %s1772_s17, %s2329_s9 }
  0x34   :  { %p1778_p4 = pnand %p1776_p3, %p1773_p2 }
  0x36   :  { %1781 = shalt.err (!%p1778_p4)
}
  0x37   :  { %s1782_s18 = scalar_lea.vmem %s100_s29, 1024  ;;  %p1787_p6 = scmp.lt.s32.totalorder %s100_s29, %s100_s29 }
  0x38   :  { %p1783_p5 = scmp.ne.s32.totalorder %s100_s29, %s1782_s18  ;;  %p1788_p7 = scmp.lt.s32.totalorder %s1782_s18, %s1782_s18 }
  0x3a   :  { %p1789_p8 = por %p1788_p7, %p1787_p6 }
  0x3c   :  { %p1790_p9 = pnand %p1789_p8, %p1783_p5 }
  0x3e   :  { %1793 = shalt.err (!%p1790_p9)
}
  0x3f   :  { %105 = dma.hbm_to_vmem [thread:$0]  %s2329_s9, 1024, %s100_s29, [#allocation12], %s1961_s20, %s1961_s20, %s1962_s21  }
  0x40   :  { %s1965_s19 = smov [#allocation14]   ;;  %s1966_s25 = smov [#allocation2]  }
  0x41   :  { %s127_s1 = sshll.u32 %s1965_s19, 4  ;;  %s34_s28 = sshll.u32 %s1966_s25, 4  ;;  %s128_s1 = int_to_ptr.vmem [resolvable:$true] %s127_s1  ;;  %s35_s28 = int_to_ptr.vmem [resolvable:$true] %s34_s28 }
  0x42   :  { %s1794_s16 = scalar_lea.hbm %s2333_s13, 1024 }
  0x43   :  { %p1795_p10 = scmp.ne.s32.totalorder %s2333_s13, %s1794_s16  ;;  %p1798_p11 = scmp.lt.u32.totalorder %s1794_s16, %s2333_s13 }
  0x45   :  { %p1800_p12 = pnand %p1798_p11, %p1795_p10 }
  0x47   :  { %1803 = shalt.err (!%p1800_p12)
}
  0x48   :  { %s1804_s9 = scalar_lea.vmem %s128_s1, 1024  ;;  %p1809_p0 = scmp.lt.s32.totalorder %s128_s1, %s128_s1 }
  0x49   :  { %p1805_p13 = scmp.ne.s32.totalorder %s128_s1, %s1804_s9  ;;  %p1810_p1 = scmp.lt.s32.totalorder %s1804_s9, %s1804_s9 }
  0x4b   :  { %p1811_p2 = por %p1810_p1, %p1809_p0 }
  0x4d   :  { %p1812_p3 = pnand %p1811_p2, %p1805_p13 }
  0x4f   :  { %1815 = shalt.err (!%p1812_p3)
}
  0x50   :  { %133 = dma.hbm_to_vmem [thread:$0]  %s2333_s13, 1024, %s128_s1, [#allocation15], %s1961_s20, %s1961_s20, %s1962_s21  }
  0x51   :  { %s2346_s26 = sld [smem:[#allocation24_spill]] }
  0x57   :  { %s1816_s19 = scalar_lea.hbm %s2346_s26, 256 }
  0x58   :  { %p1817_p4 = scmp.ne.s32.totalorder %s2346_s26, %s1816_s19  ;;  %p1820_p5 = scmp.lt.u32.totalorder %s1816_s19, %s2346_s26 }
  0x5a   :  { %p1822_p6 = pnand %p1820_p5, %p1817_p4 }
  0x5c   :  { %1825 = shalt.err (!%p1822_p6)
}
  0x5d   :  { %s1826_s17 = scalar_lea.vmem %s35_s28, 256  ;;  %p1831_p8 = scmp.lt.s32.totalorder %s35_s28, %s35_s28 }
  0x5e   :  { %p1827_p7 = scmp.ne.s32.totalorder %s35_s28, %s1826_s17  ;;  %p1832_p9 = scmp.lt.s32.totalorder %s1826_s17, %s1826_s17 }
  0x60   :  { %p1833_p10 = por %p1832_p9, %p1831_p8 }
  0x62   :  { %p1834_p11 = pnand %p1833_p10, %p1827_p7 }
  0x64   :  { %1837 = shalt.err (!%p1834_p11)
}
  0x65   :  { %37 = dma.hbm_to_vmem [thread:$0]  %s2346_s26, 256, %s35_s28, [#allocation3]  }
  0x66   :  { %s1967_s24 = smov [#allocation7]   ;;  %s1968_s0 = smov [#allocation10]  }
  0x67   :  { %s57_s27 = sshll.u32 %s1967_s24, 4  ;;  %s85_s9 = sshll.u32 %s1968_s0, 4  ;;  %s58_s27 = int_to_ptr.vmem [resolvable:$true] %s57_s27  ;;  %s86_s9 = int_to_ptr.vmem [resolvable:$true] %s85_s9 }
  0x68   :  { %s1838_s18 = scalar_lea.hbm %s2323_s3, 1024 }
  0x69   :  { %p1839_p12 = scmp.ne.s32.totalorder %s2323_s3, %s1838_s18  ;;  %p1842_p13 = scmp.lt.u32.totalorder %s1838_s18, %s2323_s3 }
  0x6b   :  { %p1844_p0 = pnand %p1842_p13, %p1839_p12 }
  0x6d   :  { %1847 = shalt.err (!%p1844_p0)
}
  0x6e   :  { %s1848_s28 = scalar_lea.vmem %s58_s27, 1024  ;;  %p1853_p2 = scmp.lt.s32.totalorder %s58_s27, %s58_s27 }
  0x6f   :  { %p1849_p1 = scmp.ne.s32.totalorder %s58_s27, %s1848_s28  ;;  %p1854_p3 = scmp.lt.s32.totalorder %s1848_s28, %s1848_s28 }
  0x71   :  { %p1855_p4 = por %p1854_p3, %p1853_p2 }
  0x73   :  { %p1856_p5 = pnand %p1855_p4, %p1849_p1 }
  0x75   :  { %1859 = shalt.err (!%p1856_p5)
}
  0x76   :  { %63 = dma.hbm_to_vmem [thread:$0]  %s2323_s3, 1024, %s58_s27, [#allocation6], %s1961_s20, %s1961_s20, %s1962_s21  }
  0x77   :  { %s1860_s13 = scalar_lea.hbm %s2327_s7, 1024 }
  0x78   :  { %p1861_p6 = scmp.ne.s32.totalorder %s2327_s7, %s1860_s13  ;;  %p1864_p7 = scmp.lt.u32.totalorder %s1860_s13, %s2327_s7 }
  0x7a   :  { %p1866_p8 = pnand %p1864_p7, %p1861_p6 }
  0x7c   :  { %1869 = shalt.err (!%p1866_p8)
}
  0x7d   :  { %s1870_s30 = scalar_lea.vmem %s86_s9, 1024  ;;  %p1875_p10 = scmp.lt.s32.totalorder %s86_s9, %s86_s9 }
  0x7e   :  { %p1871_p9 = scmp.ne.s32.totalorder %s86_s9, %s1870_s30  ;;  %p1876_p11 = scmp.lt.s32.totalorder %s1870_s30, %s1870_s30 }
  0x80   :  { %p1877_p12 = por %p1876_p11, %p1875_p10 }
  0x82   :  { %p1878_p13 = pnand %p1877_p12, %p1871_p9 }
  0x84   :  { %1881 = shalt.err (!%p1878_p13)
}
  0x85   :  { %91 = dma.hbm_to_vmem [thread:$0]  %s2327_s7, 1024, %s86_s9, [#allocation9], %s1961_s20, %s1961_s20, %s1962_s21  }
  0x86   :  { %s1969_s18 = smov [#allocation13]   ;;  %s1970_s19 = smov [#allocation16]  }
  0x87   :  { %s113_s5 = sshll.u32 %s1969_s18, 4  ;;  %s141_s25 = sshll.u32 %s1970_s19, 4  ;;  %s114_s5 = int_to_ptr.vmem [resolvable:$true] %s113_s5  ;;  %s142_s25 = int_to_ptr.vmem [resolvable:$true] %s141_s25 }
  0x88   :  { %s1882_s26 = scalar_lea.hbm %s2331_s11, 1024 }
  0x89   :  { %p1883_p0 = scmp.ne.s32.totalorder %s2331_s11, %s1882_s26  ;;  %p1886_p1 = scmp.lt.u32.totalorder %s1882_s26, %s2331_s11 }
  0x8b   :  { %p1888_p2 = pnand %p1886_p1, %p1883_p0 }
  0x8d   :  { %1891 = shalt.err (!%p1888_p2)
}
  0x8e   :  { %s1892_s7 = scalar_lea.vmem %s114_s5, 1024  ;;  %p1897_p4 = scmp.lt.s32.totalorder %s114_s5, %s114_s5 }
  0x8f   :  { %p1893_p3 = scmp.ne.s32.totalorder %s114_s5, %s1892_s7  ;;  %p1898_p5 = scmp.lt.s32.totalorder %s1892_s7, %s1892_s7 }
  0x91   :  { %p1899_p6 = por %p1898_p5, %p1897_p4 }
  0x93   :  { %p1900_p7 = pnand %p1899_p6, %p1893_p3 }
  0x95   :  { %1903 = shalt.err (!%p1900_p7)
}
  0x96   :  { %119 = dma.hbm_to_vmem [thread:$0]  %s2331_s11, 1024, %s114_s5, [#allocation12], %s1961_s20, %s1961_s20, %s1962_s21  }
  0x97   :  { %s1904_s29 = scalar_lea.hbm %s2335_s15, 1024 }
  0x98   :  { %p1905_p8 = scmp.ne.s32.totalorder %s2335_s15, %s1904_s29  ;;  %p1908_p9 = scmp.lt.u32.totalorder %s1904_s29, %s2335_s15 }
  0x9a   :  { %p1910_p10 = pnand %p1908_p9, %p1905_p8 }
  0x9c   :  { %1913 = shalt.err (!%p1910_p10)
}
  0x9d   :  { %s1914_s19 = scalar_lea.vmem %s142_s25, 1024  ;;  %p1919_p12 = scmp.lt.s32.totalorder %s142_s25, %s142_s25 }
  0x9e   :  { %p1915_p11 = scmp.ne.s32.totalorder %s142_s25, %s1914_s19  ;;  %p1920_p13 = scmp.lt.s32.totalorder %s1914_s19, %s1914_s19 }
  0xa0   :  { %p1921_p0 = por %p1920_p13, %p1919_p12 }
  0xa2   :  { %p1922_p1 = pnand %p1921_p0, %p1915_p11 }
  0xa4   :  { %1925 = shalt.err (!%p1922_p1)
}
  0xa5   :  { %147 = dma.hbm_to_vmem [thread:$0]  %s2335_s15, 1024, %s142_s25, [#allocation15], %s1961_s20, %s1961_s20, %s1962_s21  }
  0xa6   :  { %1948 = dma.done.wait [#allocation3], 256  }
  0xa7   :  { %1949 = vsyncadd [#allocation3], 4294967040 }
  0xa8   :  { %1950 = dma.done.wait [#allocation6], 3072  }
  0xa9   :  { %1951 = vsyncadd [#allocation6], 4294964224 }
  0xaa   :  { %1952 = dma.done.wait [#allocation9], 2048  }
  0xab   :  { %1953 = vsyncadd [#allocation9], 4294965248 }
  0xac   :  { %1954 = dma.done.wait [#allocation12], 2048  }
  0xad   :  { %1955 = vsyncadd [#allocation12], 4294965248 }
  0xae   :  { %1956 = dma.done.wait [#allocation15], 2048  }
  0xaf   :  { %1957 = vsyncadd [#allocation15], 4294965248  ;;  %v1642_v0 = vld [vmem:[#allocation5 + $0x40] sm:$0xff]   ;;  %v1644_v2 = vld [vmem:[#allocation5 + $0x48] sm:$0xff]   ;;  %v1971_v21 = vmov 0.0   ;;  %vm1972_vm0 = vmmov 0   ;;  %v371_v51 = vlaneseq }
  0xb0   :  { %v1643_v1 = vld [vmem:[#allocation5] sm:$0xff]   ;;  %1403 = vmatprep.subr.bf16.mxu0 %v1642_v0  ;;  %v1645_v3 = vld [vmem:[#allocation5 + $0x8] sm:$0xff]   ;;  %v1646_v4 = vld [vmem:[#allocation5 + $0x50] sm:$0xff]   ;;  %1488 = vmatprep.subr.bf16.mxu1 %v1971_v21  ;;  %s2347_s13 = sld [smem:[#allocation26_spill]]  ;;  %s1973_s7 = smov [#allocation17]  }
  0xb1   :  { %1404 = vmatpush3.bf16.msra.mxu0 %v1643_v1  ;;  %v1647_v5 = vld [vmem:[#allocation5 + $0x10] sm:$0xff]   ;;  %v1648_v6 = vld [vmem:[#allocation5 + $0x58] sm:$0xff]   ;;  %v1650_v8 = vld [vmem:[#allocation5 + $0x60] sm:$0xff]   ;;  %1504 = vmatprep.mubr.msk.bf16.mxu1 %vm1972_vm0, %v1971_v21  ;;  %v372_v52 = vshrl.u32 %v371_v51, 7  ;;  %s1317_s9 = sshll.u32 %s1973_s7, 4  ;;  %s1318_s9 = int_to_ptr.vmem [resolvable:$true] %s1317_s9 }
  0xb2   :  { %1405 = vmatprep.subr.bf16.mxu0 %v1644_v2  ;;  %v1649_v7 = vld [vmem:[#allocation5 + $0x18] sm:$0xff]   ;;  %v1651_v9 = vld [vmem:[#allocation5 + $0x20] sm:$0xff]   ;;  %v1652_v10 = vld [vmem:[#allocation5 + $0x68] sm:$0xff]   ;;  %p1931_p3 = scmp.lt.s32.totalorder %s1318_s9, %s1318_s9 }
  0xb3   :  { %v179_v11 = vld [vmem:[#allocation2 + $0x8] sm:$0xff]  ;;  %v1653_v12 = vld [vmem:[#allocation5 + $0x28] sm:$0xff]   ;;  %v1654_v14 = vld [vmem:[#allocation5 + $0x70] sm:$0xff]   ;;  %v2213_v54 = vsub.s32 0, %v372_v52  ;;  %v2215_v55 = vsub.s32 1, %v372_v52 }
  0xb4   :  { %v214_v13 = vpack.c.bf16 %v179_v11, %v179_v11  ;;  %v1655_v15 = vld [vmem:[#allocation5 + $0x30] sm:$0xff]   ;;  %v1656_v16 = vld [vmem:[#allocation5 + $0x78] sm:$0xff]   ;;  %v1658_v20 = vld [vmem:[#allocation7] sm:$0xff]  }
  0xb5   :  { %1406 = vmatpush3.bf16.msra.mxu0 %v1645_v3  ;;  %v1657_v17 = vld [vmem:[#allocation5 + $0x38] sm:$0xff]   ;;  %v178_v18 = vld [vmem:[#allocation2] sm:$0xff]  ;;  %1489 = vmatpush3.bf16.msra.mxu1 %v1658_v20  ;;  %v1659_v22 = vld [vmem:[#allocation7 + $0x8] sm:$0xff]  }
  0xb6   :  { %1407 = vmatprep.subr.bf16.mxu0 %v1646_v4  ;;  %343 = vmatprep.mubr.bf16.mxu0 %v214_v13  ;;  %v213_v19 = vpack.c.bf16 %v178_v18, %v178_v18  ;;  %v1660_v23 = vld [vmem:[#allocation7 + $0x10] sm:$0xff]   ;;  %v1661_v24 = vld [vmem:[#allocation7 + $0x18] sm:$0xff]   ;;  %v1662_v25 = vld [vmem:[#allocation7 + $0x20] sm:$0xff]  }
  0xb7   :  { %1490 = vmatprep.subr.bf16.mxu1 %v1971_v21  ;;  %v1663_v26 = vld [vmem:[#allocation7 + $0x28] sm:$0xff]   ;;  %v1664_v27 = vld [vmem:[#allocation7 + $0x30] sm:$0xff]   ;;  %v1665_v28 = vld [vmem:[#allocation7 + $0x38] sm:$0xff]  }
  0xb8   :  { %v212_v53 = vld [vmem:[%s2322_s2] sm:$0x3]  ;;  %v1666_v0 = vld [vmem:[#allocation8] sm:$0xff]   ;;  %v1667_v1 = vld [vmem:[#allocation8 + $0x8] sm:$0xff]  }
  0xb9   :  { %1408 = vmatpush3.bf16.msra.mxu0 %v1647_v5  ;;  %1491 = vmatpush3.bf16.msra.mxu1 %v1659_v22  ;;  %v379_v59 = vrot.slane %v212_v53, %v2215_v55  ;;  %v1668_v2 = vld [vmem:[#allocation8 + $0x10] sm:$0xff]   ;;  %v1669_v3 = vld [vmem:[#allocation8 + $0x18] sm:$0xff]   ;;  %v1670_v4 = vld [vmem:[#allocation8 + $0x20] sm:$0xff]  }
  0xba   :  { %1409 = vmatprep.subr.bf16.mxu0 %v1648_v6  ;;  %1492 = vmatprep.subr.bf16.mxu1 %v1971_v21  ;;  %v1671_v5 = vld [vmem:[#allocation8 + $0x28] sm:$0xff]   ;;  %v1672_v6 = vld [vmem:[#allocation8 + $0x30] sm:$0xff]  }
  0xbd   :  { %1410 = vmatpush3.bf16.msra.mxu0 %v1649_v7  ;;  %1493 = vmatpush3.bf16.msra.mxu1 %v1660_v23  ;;  %v1673_v7 = vld [vmem:[#allocation8 + $0x38] sm:$0xff]  }
  0xbe   :  { %1411 = vmatprep.subr.bf16.mxu0 %v1650_v8  ;;  %1494 = vmatprep.subr.bf16.mxu1 %v1971_v21 }
  0xc1   :  { %1412 = vmatpush3.bf16.msra.mxu0 %v1651_v9  ;;  %1495 = vmatpush3.bf16.msra.mxu1 %v1661_v24 }
  0xc2   :  { %1413 = vmatprep.subr.bf16.mxu0 %v1652_v10  ;;  %1496 = vmatprep.subr.bf16.mxu1 %v1971_v21 }
  0xc5   :  { %1414 = vmatpush3.bf16.msra.mxu0 %v1653_v12  ;;  %1497 = vmatpush3.bf16.msra.mxu1 %v1662_v25 }
  0xc6   :  { %1415 = vmatprep.subr.bf16.mxu0 %v1654_v14  ;;  %1498 = vmatprep.subr.bf16.mxu1 %v1971_v21 }
  0xc9   :  { %1416 = vmatpush3.bf16.msra.mxu0 %v1655_v15  ;;  %1499 = vmatpush3.bf16.msra.mxu1 %v1663_v26 }
  0xca   :  { %1417 = vmatprep.subr.bf16.mxu0 %v1656_v16  ;;  %1500 = vmatprep.subr.bf16.mxu1 %v1971_v21 }
  0xcd   :  { %1418 = vmatpush3.bf16.msra.mxu0 %v1657_v17  ;;  %1501 = vmatpush3.bf16.msra.mxu1 %v1664_v27 }
  0xce   :  { %1508 = vmatprep.subr.bf16.mxu0 %v1971_v21  ;;  %1502 = vmatprep.subr.bf16.mxu1 %v1971_v21 }
  0xd0   :  { %344 = vmatmul.mubr.bf16.vlgmr.msra.gmra.mrb[0].mxu0 %v213_v19 }
  0xd1   :  { %1524 = vmatprep.mubr.msk.bf16.mxu0 %vm1972_vm0, %v1971_v21  ;;  %1503 = vmatpush3.bf16.msra.mxu1 %v1665_v28 }
  0xd2   :  { %1528 = vmatprep.subr.bf16.mxu1 %v1971_v21  ;;  %1509 = vmatpush3.bf16.msra.mxu0 %v1666_v0 }
  0xd3   :  { %1510 = vmatprep.subr.bf16.mxu0 %v1971_v21 }
  0xd6   :  { %1511 = vmatpush3.bf16.msra.mxu0 %v1667_v1 }
  0xd7   :  { %1512 = vmatprep.subr.bf16.mxu0 %v1971_v21 }
  0xda   :  { %1513 = vmatpush3.bf16.msra.mxu0 %v1668_v2 }
  0xdb   :  { %1514 = vmatprep.subr.bf16.mxu0 %v1971_v21 }
  0xde   :  { %1515 = vmatpush3.bf16.msra.mxu0 %v1669_v3 }
  0xdf   :  { %1516 = vmatprep.subr.bf16.mxu0 %v1971_v21 }
  0xe2   :  { %1517 = vmatpush3.bf16.msra.mxu0 %v1670_v4 }
  0xe3   :  { %1518 = vmatprep.subr.bf16.mxu0 %v1971_v21 }
  0xe6   :  { %1519 = vmatpush3.bf16.msra.mxu0 %v1671_v5 }
  0xe7   :  { %1520 = vmatprep.subr.bf16.mxu0 %v1971_v21 }
  0xea   :  { %1521 = vmatpush3.bf16.msra.mxu0 %v1672_v6  ;;  %v534_v6 = vld [vmem:[%s2326_s6] sm:$0x3] }
  0xeb   :  { %1522 = vmatprep.subr.bf16.mxu0 %v1971_v21 }
  0xee   :  { %1523 = vmatpush3.bf16.msra.mxu0 %v1673_v7 }
  0xef   :  { %1548 = vmatprep.subr.bf16.mxu0 %v1971_v21 }
 0x1a3   :  { %v1419_v29 = vpop.f32.mrb[0].mxu0 }
 0x1a4   :  { %v1420_v30 = vpop.f32.mrb[1].mxu0 }
 0x1a5   :  { %v1421_v31 = vadd.f32 %v1420_v30, %v1419_v29  ;;  %v1422_v32 = vpop.f32.mrb[2].mxu0  ;;  %v398_v30 = vld [vmem:[%s2324_s4] sm:$0x3] }
 0x1a6   :  { %v1423_v33 = vpop.f32.mrb[3].mxu0 }
 0x1a7   :  { %v351_v34 = vrot.slane %v1421_v31, 4 }
 0x1a9   :  { %v352_v35 = vadd.f32 %v1421_v31, %v351_v34  ;;  %v515_v34 = vrot.slane %v398_v30, %v2215_v55 }
 0x1ab   :  { %v353_v36 = vrot.slane %v352_v35, 2 }
 0x1ad   :  { %v354_v37 = vadd.f32 %v353_v36, %v352_v35 }
 0x1af   :  { %v355_v38 = vrot.slane %v354_v37, 1 }
 0x1b1   :  { %v356_v39 = vadd.f32 %v355_v38, %v354_v37 }
 0x1b3   :  { %v358_v40 = vmul.f32 0.125, %v356_v39  ;;  %v1674_v39 = vld [vmem:[#allocation10] sm:$0xff]  }
 0x1b5   :  { %v359_v41 = vsub.f32 %v1421_v31, %v358_v40  ;;  %v1675_v40 = vld [vmem:[#allocation10 + $0x8] sm:$0xff]  }
 0x1b7   :  { %v360_v42 = vmul.f32 %v359_v41, %v359_v41 }
 0x1b9   :  { %v361_v43 = vrot.slane %v360_v42, 4 }
 0x1bb   :  { %v362_v44 = vadd.f32 %v361_v43, %v360_v42  ;;  %v1677_v42 = vld [vmem:[#allocation10 + $0x18] sm:$0xff]   ;;  %v1678_v43 = vld [vmem:[#allocation10 + $0x20] sm:$0xff]  }
 0x1bd   :  { %v363_v45 = vrot.slane %v362_v44, 2 }
 0x1bf   :  { %v364_v46 = vadd.f32 %v363_v45, %v362_v44  ;;  %v1679_v44 = vld [vmem:[#allocation10 + $0x28] sm:$0xff]   ;;  %v1680_v45 = vld [vmem:[#allocation10 + $0x30] sm:$0xff]  }
 0x1c1   :  { %v365_v47 = vrot.slane %v364_v46, 1 }
 0x1c3   :  { %v366_v48 = vadd.f32 %v365_v47, %v364_v46  ;;  %v1681_v46 = vld [vmem:[#allocation10 + $0x38] sm:$0xff]  }
 0x1c5   :  { %v367_v49 = vmul.f32 0.125, %v366_v48 }
 0x1c7   :  { %v368_v50 = vadd.f32 1e-05, %v367_v49 }
 0x1c9   :  { %1714 = vrsqrt.f32 %v368_v50 }
 0x1d3   :  { %v1715_v56 = vpop.eup %1714 }
 0x1d4   :  { %v370_v57 = vmul.f32 %v1715_v56, %v212_v53 }
 0x1d6   :  { %v374_v58 = vrot.slane %v370_v57, %v2213_v54 }
 0x1d8   :  { %v375_v60 = vmul.f32 %v374_v58, %v359_v41  ;;  %v1676_v41 = vld [vmem:[#allocation10 + $0x10] sm:$0xff]  }
 0x1da   :  { %v380_v61 = vadd.f32 %v379_v59, %v375_v60 }
 0x1dc   :  { %v381_v62 = vmax.f32 %v380_v61, 0.0 }
 0x1de   :  { %v399_v63 = vpack.c.bf16 %v381_v62, %v381_v62 }
 0x1e0   :  { %1505 = vmatmul.mubr.bf16.vlgmr.msra.gmra.mrb[0].mxu1 %v399_v63 }
 0x1e1   :  { %1544 = vmatprep.mubr.msk.bf16.mxu1 %vm1972_vm0, %v1971_v21  ;;  %1529 = vmatpush3.bf16.msra.mxu1 %v1674_v39 }
 0x1e2   :  { %1530 = vmatprep.subr.bf16.mxu1 %v1971_v21 }
 0x1e5   :  { %1531 = vmatpush3.bf16.msra.mxu1 %v1675_v40 }
 0x1e6   :  { %1532 = vmatprep.subr.bf16.mxu1 %v1971_v21 }
 0x1e9   :  { %1533 = vmatpush3.bf16.msra.mxu1 %v1676_v41 }
 0x1ea   :  { %1534 = vmatprep.subr.bf16.mxu1 %v1971_v21 }
 0x1ed   :  { %1535 = vmatpush3.bf16.msra.mxu1 %v1677_v42 }
 0x1ee   :  { %1536 = vmatprep.subr.bf16.mxu1 %v1971_v21 }
 0x1f1   :  { %1537 = vmatpush3.bf16.msra.mxu1 %v1678_v43 }
 0x1f2   :  { %1538 = vmatprep.subr.bf16.mxu1 %v1971_v21 }
 0x1f5   :  { %1539 = vmatpush3.bf16.msra.mxu1 %v1679_v44 }
 0x1f6   :  { %1540 = vmatprep.subr.bf16.mxu1 %v1971_v21 }
 0x1f9   :  { %1541 = vmatpush3.bf16.msra.mxu1 %v1680_v45  ;;  %v670_v45 = vld [vmem:[%s2328_s8] sm:$0x3] }
 0x1fa   :  { %1542 = vmatprep.subr.bf16.mxu1 %v1971_v21 }
 0x1fd   :  { %1543 = vmatpush3.bf16.msra.mxu1 %v1681_v46 }
 0x1fe   :  { %1568 = vmatprep.subr.bf16.mxu1 %v1971_v21 }
 0x2b3   :  { %v482_v8 = vpop.f32.mrb[0].mxu1 }
 0x2b4   :  { %v488_v9 = vrot.slane %v482_v8, 4  ;;  %v1506_v10 = vpop.f32.mrb[1].mxu1 }
 0x2b5   :  { %v485_v11 = vpop.f32.mrb[2].mxu1  ;;  %v651_v10 = vrot.slane %v534_v6, %v2215_v55 }
 0x2b6   :  { %v489_v12 = vadd.f32 %v488_v9, %v482_v8  ;;  %v1507_v13 = vpop.f32.mrb[3].mxu1 }
 0x2b8   :  { %v490_v14 = vrot.slane %v489_v12, 2 }
 0x2ba   :  { %v491_v15 = vadd.f32 %v490_v14, %v489_v12 }
 0x2bc   :  { %v492_v16 = vrot.slane %v491_v15, 1 }
 0x2be   :  { %v493_v17 = vadd.f32 %v492_v16, %v491_v15  ;;  %v1682_v15 = vld [vmem:[#allocation11] sm:$0xff]   ;;  %v1683_v16 = vld [vmem:[#allocation11 + $0x8] sm:$0xff]  }
 0x2c0   :  { %v494_v18 = vmul.f32 0.125, %v493_v17  ;;  %v1684_v17 = vld [vmem:[#allocation11 + $0x10] sm:$0xff]  }
 0x2c2   :  { %v495_v19 = vsub.f32 %v482_v8, %v494_v18  ;;  %v1685_v18 = vld [vmem:[#allocation11 + $0x18] sm:$0xff]  }
 0x2c4   :  { %v496_v20 = vmul.f32 %v495_v19, %v495_v19 }
 0x2c6   :  { %v497_v22 = vrot.slane %v496_v20, 4 }
 0x2c8   :  { %v498_v23 = vadd.f32 %v497_v22, %v496_v20  ;;  %v1687_v20 = vld [vmem:[#allocation11 + $0x28] sm:$0xff]   ;;  %v1688_v22 = vld [vmem:[#allocation11 + $0x30] sm:$0xff]  }
 0x2ca   :  { %v499_v24 = vrot.slane %v498_v23, 2 }
 0x2cc   :  { %v500_v25 = vadd.f32 %v499_v24, %v498_v23  ;;  %v1689_v23 = vld [vmem:[#allocation11 + $0x38] sm:$0xff]  }
 0x2ce   :  { %v501_v26 = vrot.slane %v500_v25, 1 }
 0x2d0   :  { %v502_v27 = vadd.f32 %v501_v26, %v500_v25 }
 0x2d2   :  { %v503_v28 = vmul.f32 0.125, %v502_v27 }
 0x2d4   :  { %v504_v29 = vadd.f32 1e-05, %v503_v28 }
 0x2d6   :  { %1716 = vrsqrt.f32 %v504_v29 }
 0x2e0   :  { %v1717_v31 = vpop.eup %1716 }
 0x2e1   :  { %v506_v32 = vmul.f32 %v1717_v31, %v398_v30 }
 0x2e3   :  { %v510_v33 = vrot.slane %v506_v32, %v2213_v54 }
 0x2e5   :  { %v511_v35 = vmul.f32 %v510_v33, %v495_v19  ;;  %v1686_v19 = vld [vmem:[#allocation11 + $0x20] sm:$0xff]  }
 0x2e7   :  { %v516_v36 = vadd.f32 %v515_v34, %v511_v35 }
 0x2e9   :  { %v517_v37 = vmax.f32 %v516_v36, 0.0 }
 0x2eb   :  { %v535_v38 = vpack.c.bf16 %v517_v37, %v517_v37 }
 0x2ed   :  { %1525 = vmatmul.mubr.bf16.vlgmr.msra.gmra.mrb[4].mxu0 %v535_v38 }
 0x2ee   :  { %1564 = vmatprep.mubr.msk.bf16.mxu0 %vm1972_vm0, %v1971_v21  ;;  %1549 = vmatpush3.bf16.msra.mxu0 %v1682_v15 }
 0x2ef   :  { %1550 = vmatprep.subr.bf16.mxu0 %v1971_v21 }
 0x2f2   :  { %1551 = vmatpush3.bf16.msra.mxu0 %v1683_v16 }
 0x2f3   :  { %1552 = vmatprep.subr.bf16.mxu0 %v1971_v21 }
 0x2f6   :  { %1553 = vmatpush3.bf16.msra.mxu0 %v1684_v17 }
 0x2f7   :  { %1554 = vmatprep.subr.bf16.mxu0 %v1971_v21 }
 0x2fa   :  { %1555 = vmatpush3.bf16.msra.mxu0 %v1685_v18 }
 0x2fb   :  { %1556 = vmatprep.subr.bf16.mxu0 %v1971_v21 }
 0x2fe   :  { %1557 = vmatpush3.bf16.msra.mxu0 %v1686_v19 }
 0x2ff   :  { %1558 = vmatprep.subr.bf16.mxu0 %v1971_v21 }
 0x302   :  { %1559 = vmatpush3.bf16.msra.mxu0 %v1687_v20 }
 0x303   :  { %1560 = vmatprep.subr.bf16.mxu0 %v1971_v21 }
 0x306   :  { %1561 = vmatpush3.bf16.msra.mxu0 %v1688_v22  ;;  %v806_v22 = vld [vmem:[%s2330_s10] sm:$0x3] }
 0x307   :  { %1562 = vmatprep.subr.bf16.mxu0 %v1971_v21 }
 0x30a   :  { %1563 = vmatpush3.bf16.msra.mxu0 %v1689_v23 }
 0x30b   :  { %1588 = vmatprep.subr.bf16.mxu0 %v1971_v21 }
 0x3c0   :  { %v618_v47 = vpop.f32.mrb[4].mxu0 }
 0x3c1   :  { %v624_v48 = vrot.slane %v618_v47, 4  ;;  %v1526_v49 = vpop.f32.mrb[5].mxu0 }
 0x3c2   :  { %v621_v50 = vpop.f32.mrb[6].mxu0  ;;  %v787_v49 = vrot.slane %v670_v45, %v2215_v55 }
 0x3c3   :  { %v625_v51 = vadd.f32 %v624_v48, %v618_v47  ;;  %v1527_v52 = vpop.f32.mrb[7].mxu0 }
 0x3c5   :  { %v626_v53 = vrot.slane %v625_v51, 2 }
 0x3c7   :  { %v627_v56 = vadd.f32 %v626_v53, %v625_v51 }
 0x3c9   :  { %v628_v57 = vrot.slane %v627_v56, 1 }
 0x3cb   :  { %v629_v58 = vadd.f32 %v628_v57, %v627_v56  ;;  %v1690_v56 = vld [vmem:[#allocation13] sm:$0xff]   ;;  %v1691_v57 = vld [vmem:[#allocation13 + $0x8] sm:$0xff]  }
 0x3cd   :  { %v630_v59 = vmul.f32 0.125, %v629_v58  ;;  %v1692_v58 = vld [vmem:[#allocation13 + $0x10] sm:$0xff]  }
 0x3cf   :  { %v631_v60 = vsub.f32 %v618_v47, %v630_v59  ;;  %v1693_v59 = vld [vmem:[#allocation13 + $0x18] sm:$0xff]  }
 0x3d1   :  { %v632_v61 = vmul.f32 %v631_v60, %v631_v60 }
 0x3d3   :  { %v633_v62 = vrot.slane %v632_v61, 4 }
 0x3d5   :  { %v634_v63 = vadd.f32 %v633_v62, %v632_v61  ;;  %v1695_v61 = vld [vmem:[#allocation13 + $0x28] sm:$0xff]   ;;  %v1696_v62 = vld [vmem:[#allocation13 + $0x30] sm:$0xff]  }
 0x3d7   :  { %v635_v0 = vrot.slane %v634_v63, 2 }
 0x3d9   :  { %v636_v1 = vadd.f32 %v635_v0, %v634_v63  ;;  %v1697_v63 = vld [vmem:[#allocation13 + $0x38] sm:$0xff]  }
 0x3db   :  { %v637_v2 = vrot.slane %v636_v1, 1 }
 0x3dd   :  { %v638_v3 = vadd.f32 %v637_v2, %v636_v1 }
 0x3df   :  { %v639_v4 = vmul.f32 0.125, %v638_v3 }
 0x3e1   :  { %v640_v5 = vadd.f32 1e-05, %v639_v4 }
 0x3e3   :  { %1718 = vrsqrt.f32 %v640_v5 }
 0x3ed   :  { %v1719_v7 = vpop.eup %1718 }
 0x3ee   :  { %v642_v8 = vmul.f32 %v1719_v7, %v534_v6 }
 0x3f0   :  { %v646_v9 = vrot.slane %v642_v8, %v2213_v54 }
 0x3f2   :  { %v647_v11 = vmul.f32 %v646_v9, %v631_v60  ;;  %v1694_v60 = vld [vmem:[#allocation13 + $0x20] sm:$0xff]  }
 0x3f4   :  { %v652_v12 = vadd.f32 %v651_v10, %v647_v11 }
 0x3f6   :  { %v653_v13 = vmax.f32 %v652_v12, 0.0 }
 0x3f8   :  { %v671_v14 = vpack.c.bf16 %v653_v13, %v653_v13 }
 0x3fa   :  { %1545 = vmatmul.mubr.bf16.vlgmr.msra.gmra.mrb[4].mxu1 %v671_v14 }
 0x3fb   :  { %1584 = vmatprep.mubr.msk.bf16.mxu1 %vm1972_vm0, %v1971_v21  ;;  %1569 = vmatpush3.bf16.msra.mxu1 %v1690_v56 }
 0x3fc   :  { %1570 = vmatprep.subr.bf16.mxu1 %v1971_v21 }
 0x3ff   :  { %1571 = vmatpush3.bf16.msra.mxu1 %v1691_v57 }
 0x400   :  { %1572 = vmatprep.subr.bf16.mxu1 %v1971_v21 }
 0x403   :  { %1573 = vmatpush3.bf16.msra.mxu1 %v1692_v58 }
 0x404   :  { %1574 = vmatprep.subr.bf16.mxu1 %v1971_v21 }
 0x407   :  { %1575 = vmatpush3.bf16.msra.mxu1 %v1693_v59 }
 0x408   :  { %1576 = vmatprep.subr.bf16.mxu1 %v1971_v21 }
 0x40b   :  { %1577 = vmatpush3.bf16.msra.mxu1 %v1694_v60 }
 0x40c   :  { %1578 = vmatprep.subr.bf16.mxu1 %v1971_v21 }
 0x40f   :  { %1579 = vmatpush3.bf16.msra.mxu1 %v1695_v61 }
 0x410   :  { %1580 = vmatprep.subr.bf16.mxu1 %v1971_v21 }
 0x413   :  { %1581 = vmatpush3.bf16.msra.mxu1 %v1696_v62  ;;  %v942_v62 = vld [vmem:[%s2332_s12] sm:$0x3] }
 0x414   :  { %1582 = vmatprep.subr.bf16.mxu1 %v1971_v21 }
 0x417   :  { %1583 = vmatpush3.bf16.msra.mxu1 %v1697_v63 }
 0x418   :  { %1608 = vmatprep.subr.bf16.mxu1 %v1971_v21 }
 0x4cd   :  { %v754_v24 = vpop.f32.mrb[4].mxu1 }
 0x4ce   :  { %v760_v25 = vrot.slane %v754_v24, 4  ;;  %v1546_v26 = vpop.f32.mrb[5].mxu1 }
 0x4cf   :  { %v757_v27 = vpop.f32.mrb[6].mxu1  ;;  %v923_v26 = vrot.slane %v806_v22, %v2215_v55 }
 0x4d0   :  { %v761_v28 = vadd.f32 %v760_v25, %v754_v24  ;;  %v1547_v29 = vpop.f32.mrb[7].mxu1 }
 0x4d2   :  { %v762_v30 = vrot.slane %v761_v28, 2 }
 0x4d4   :  { %v763_v31 = vadd.f32 %v762_v30, %v761_v28 }
 0x4d6   :  { %v764_v32 = vrot.slane %v763_v31, 1 }
 0x4d8   :  { %v765_v33 = vadd.f32 %v764_v32, %v763_v31  ;;  %v1698_v31 = vld [vmem:[#allocation14] sm:$0xff]   ;;  %v1699_v32 = vld [vmem:[#allocation14 + $0x8] sm:$0xff]  }
 0x4da   :  { %v766_v34 = vmul.f32 0.125, %v765_v33  ;;  %v1700_v33 = vld [vmem:[#allocation14 + $0x10] sm:$0xff]  }
 0x4dc   :  { %v767_v35 = vsub.f32 %v754_v24, %v766_v34  ;;  %v1701_v34 = vld [vmem:[#allocation14 + $0x18] sm:$0xff]  }
 0x4de   :  { %v768_v36 = vmul.f32 %v767_v35, %v767_v35 }
 0x4e0   :  { %v769_v37 = vrot.slane %v768_v36, 4 }
 0x4e2   :  { %v770_v38 = vadd.f32 %v769_v37, %v768_v36  ;;  %v1703_v36 = vld [vmem:[#allocation14 + $0x28] sm:$0xff]   ;;  %v1704_v37 = vld [vmem:[#allocation14 + $0x30] sm:$0xff]  }
 0x4e4   :  { %v771_v39 = vrot.slane %v770_v38, 2 }
 0x4e6   :  { %v772_v40 = vadd.f32 %v771_v39, %v770_v38  ;;  %v1705_v38 = vld [vmem:[#allocation14 + $0x38] sm:$0xff]  }
 0x4e8   :  { %v773_v41 = vrot.slane %v772_v40, 1 }
 0x4ea   :  { %v774_v42 = vadd.f32 %v773_v41, %v772_v40 }
 0x4ec   :  { %v775_v43 = vmul.f32 0.125, %v774_v42 }
 0x4ee   :  { %v776_v44 = vadd.f32 1e-05, %v775_v43 }
 0x4f0   :  { %1720 = vrsqrt.f32 %v776_v44 }
 0x4fa   :  { %v1721_v46 = vpop.eup %1720 }
 0x4fb   :  { %v778_v47 = vmul.f32 %v1721_v46, %v670_v45 }
 0x4fd   :  { %v782_v48 = vrot.slane %v778_v47, %v2213_v54 }
 0x4ff   :  { %v783_v50 = vmul.f32 %v782_v48, %v767_v35  ;;  %v1702_v35 = vld [vmem:[#allocation14 + $0x20] sm:$0xff]  }
 0x501   :  { %v788_v51 = vadd.f32 %v787_v49, %v783_v50 }
 0x503   :  { %v789_v52 = vmax.f32 %v788_v51, 0.0 }
 0x505   :  { %v807_v53 = vpack.c.bf16 %v789_v52, %v789_v52 }
 0x507   :  { %1565 = vmatmul.mubr.bf16.vlgmr.msra.gmra.mrb[8].mxu0 %v807_v53 }
 0x508   :  { %1604 = vmatprep.mubr.msk.bf16.mxu0 %vm1972_vm0, %v1971_v21  ;;  %1589 = vmatpush3.bf16.msra.mxu0 %v1698_v31 }
 0x509   :  { %1590 = vmatprep.subr.bf16.mxu0 %v1971_v21 }
 0x50c   :  { %1591 = vmatpush3.bf16.msra.mxu0 %v1699_v32 }
 0x50d   :  { %1592 = vmatprep.subr.bf16.mxu0 %v1971_v21 }
 0x510   :  { %1593 = vmatpush3.bf16.msra.mxu0 %v1700_v33 }
 0x511   :  { %1594 = vmatprep.subr.bf16.mxu0 %v1971_v21 }
 0x514   :  { %1595 = vmatpush3.bf16.msra.mxu0 %v1701_v34 }
 0x515   :  { %1596 = vmatprep.subr.bf16.mxu0 %v1971_v21 }
 0x518   :  { %1597 = vmatpush3.bf16.msra.mxu0 %v1702_v35 }
 0x519   :  { %1598 = vmatprep.subr.bf16.mxu0 %v1971_v21 }
 0x51c   :  { %1599 = vmatpush3.bf16.msra.mxu0 %v1703_v36  ;;  %v1078_v36 = vld [vmem:[%s2334_s14] sm:$0x3]  ;;  %s1926_s14 = scalar_lea.vmem %s1318_s9, 128 }
 0x51d   :  { %1600 = vmatprep.subr.bf16.mxu0 %v1971_v21  ;;  %p1927_p2 = scmp.ne.s32.totalorder %s1318_s9, %s1926_s14  ;;  %p1932_p4 = scmp.lt.s32.totalorder %s1926_s14, %s1926_s14 }
 0x51f   :  { %p1933_p5 = por %p1932_p4, %p1931_p3 }
 0x520   :  { %1601 = vmatpush3.bf16.msra.mxu0 %v1704_v37 }
 0x521   :  { %1602 = vmatprep.subr.bf16.mxu0 %v1971_v21  ;;  %p1934_p6 = pnand %p1933_p5, %p1927_p2 }
 0x524   :  { %1603 = vmatpush3.bf16.msra.mxu0 %v1705_v38 }
 0x5da   :  { %v890_v0 = vpop.f32.mrb[8].mxu0 }
 0x5db   :  { %v896_v1 = vrot.slane %v890_v0, 4  ;;  %v1566_v2 = vpop.f32.mrb[9].mxu0 }
 0x5dc   :  { %v893_v3 = vpop.f32.mrb[10].mxu0  ;;  %v1059_v2 = vrot.slane %v942_v62, %v2215_v55 }
 0x5dd   :  { %v897_v4 = vadd.f32 %v896_v1, %v890_v0  ;;  %v1567_v5 = vpop.f32.mrb[11].mxu0 }
 0x5df   :  { %v898_v6 = vrot.slane %v897_v4, 2 }
 0x5e1   :  { %v899_v7 = vadd.f32 %v898_v6, %v897_v4 }
 0x5e3   :  { %v900_v8 = vrot.slane %v899_v7, 1 }
 0x5e5   :  { %v901_v9 = vadd.f32 %v900_v8, %v899_v7  ;;  %v1706_v7 = vld [vmem:[#allocation16] sm:$0xff]   ;;  %v1707_v8 = vld [vmem:[#allocation16 + $0x8] sm:$0xff]  }
 0x5e7   :  { %v902_v10 = vmul.f32 0.125, %v901_v9  ;;  %v1708_v9 = vld [vmem:[#allocation16 + $0x10] sm:$0xff]  }
 0x5e9   :  { %v903_v11 = vsub.f32 %v890_v0, %v902_v10  ;;  %v1709_v10 = vld [vmem:[#allocation16 + $0x18] sm:$0xff]  }
 0x5eb   :  { %v904_v12 = vmul.f32 %v903_v11, %v903_v11 }
 0x5ed   :  { %v905_v13 = vrot.slane %v904_v12, 4 }
 0x5ef   :  { %v906_v14 = vadd.f32 %v905_v13, %v904_v12  ;;  %v1711_v12 = vld [vmem:[#allocation16 + $0x28] sm:$0xff]   ;;  %v1712_v13 = vld [vmem:[#allocation16 + $0x30] sm:$0xff]  }
 0x5f1   :  { %v907_v15 = vrot.slane %v906_v14, 2 }
 0x5f3   :  { %v908_v16 = vadd.f32 %v907_v15, %v906_v14  ;;  %v1713_v14 = vld [vmem:[#allocation16 + $0x38] sm:$0xff]  }
 0x5f5   :  { %v909_v17 = vrot.slane %v908_v16, 1 }
 0x5f7   :  { %v910_v18 = vadd.f32 %v909_v17, %v908_v16 }
 0x5f9   :  { %v911_v19 = vmul.f32 0.125, %v910_v18 }
 0x5fb   :  { %v912_v20 = vadd.f32 1e-05, %v911_v19 }
 0x5fd   :  { %1722 = vrsqrt.f32 %v912_v20 }
 0x607   :  { %v1723_v23 = vpop.eup %1722 }
 0x608   :  { %v914_v24 = vmul.f32 %v1723_v23, %v806_v22 }
 0x60a   :  { %v918_v25 = vrot.slane %v914_v24, %v2213_v54 }
 0x60c   :  { %v919_v27 = vmul.f32 %v918_v25, %v903_v11  ;;  %v1710_v11 = vld [vmem:[#allocation16 + $0x20] sm:$0xff]  }
 0x60e   :  { %v924_v28 = vadd.f32 %v923_v26, %v919_v27 }
 0x610   :  { %v925_v29 = vmax.f32 %v924_v28, 0.0 }
 0x612   :  { %v943_v30 = vpack.c.bf16 %v925_v29, %v925_v29 }
 0x614   :  { %1585 = vmatmul.mubr.bf16.vlgmr.msra.gmra.mrb[8].mxu1 %v943_v30 }
 0x615   :  { %1624 = vmatprep.mubr.msk.bf16.mxu1 %vm1972_vm0, %v1971_v21  ;;  %1609 = vmatpush3.bf16.msra.mxu1 %v1706_v7 }
 0x616   :  { %1610 = vmatprep.subr.bf16.mxu1 %v1971_v21 }
 0x619   :  { %1611 = vmatpush3.bf16.msra.mxu1 %v1707_v8 }
 0x61a   :  { %1612 = vmatprep.subr.bf16.mxu1 %v1971_v21 }
 0x61d   :  { %1613 = vmatpush3.bf16.msra.mxu1 %v1708_v9 }
 0x61e   :  { %1614 = vmatprep.subr.bf16.mxu1 %v1971_v21 }
 0x621   :  { %1615 = vmatpush3.bf16.msra.mxu1 %v1709_v10 }
 0x622   :  { %1616 = vmatprep.subr.bf16.mxu1 %v1971_v21 }
 0x625   :  { %1617 = vmatpush3.bf16.msra.mxu1 %v1710_v11 }
 0x626   :  { %1618 = vmatprep.subr.bf16.mxu1 %v1971_v21 }
 0x629   :  { %1619 = vmatpush3.bf16.msra.mxu1 %v1711_v12 }
 0x62a   :  { %1620 = vmatprep.subr.bf16.mxu1 %v1971_v21 }
 0x62d   :  { %1621 = vmatpush3.bf16.msra.mxu1 %v1712_v13 }
 0x62e   :  { %1622 = vmatprep.subr.bf16.mxu1 %v1971_v21 }
 0x631   :  { %1623 = vmatpush3.bf16.msra.mxu1 %v1713_v14 }
 0x6e7   :  { %v1026_v39 = vpop.f32.mrb[8].mxu1 }
 0x6e8   :  { %v1032_v40 = vrot.slane %v1026_v39, 4  ;;  %v1586_v41 = vpop.f32.mrb[9].mxu1 }
 0x6e9   :  { %v1029_v42 = vpop.f32.mrb[10].mxu1 }
 0x6ea   :  { %v1033_v43 = vadd.f32 %v1032_v40, %v1026_v39  ;;  %v1587_v44 = vpop.f32.mrb[11].mxu1  ;;  %v1195_v40 = vrot.slane %v1078_v36, %v2215_v55 }
 0x6ec   :  { %v1034_v45 = vrot.slane %v1033_v43, 2 }
 0x6ee   :  { %v1035_v46 = vadd.f32 %v1034_v45, %v1033_v43  ;;  %v1394_v45 = vld [vmem:[%s2347_s13] ss:$0 sm:$0xff] }
 0x6f0   :  { %v1036_v47 = vrot.slane %v1035_v46, 1 }
 0x6f2   :  { %v1037_v48 = vadd.f32 %v1036_v47, %v1035_v46 }
 0x6f4   :  { %v1038_v49 = vmul.f32 0.125, %v1037_v48 }
 0x6f6   :  { %v1039_v50 = vsub.f32 %v1026_v39, %v1038_v49 }
 0x6f8   :  { %v1040_v51 = vmul.f32 %v1039_v50, %v1039_v50 }
 0x6fa   :  { %v1041_v52 = vrot.slane %v1040_v51, 4 }
 0x6fc   :  { %v1042_v53 = vadd.f32 %v1041_v52, %v1040_v51 }
 0x6fe   :  { %v1043_v56 = vrot.slane %v1042_v53, 2 }
 0x700   :  { %v1044_v57 = vadd.f32 %v1043_v56, %v1042_v53 }
 0x702   :  { %v1045_v58 = vrot.slane %v1044_v57, 1 }
 0x704   :  { %v1046_v59 = vadd.f32 %v1045_v58, %v1044_v57 }
 0x706   :  { %v1047_v60 = vmul.f32 0.125, %v1046_v59 }
 0x708   :  { %v1048_v61 = vadd.f32 1e-05, %v1047_v60 }
 0x70a   :  { %1724 = vrsqrt.f32 %v1048_v61 }
 0x714   :  { %v1725_v63 = vpop.eup %1724 }
 0x715   :  { %v1050_v0 = vmul.f32 %v1725_v63, %v942_v62 }
 0x717   :  { %v1054_v1 = vrot.slane %v1050_v0, %v2213_v54 }
 0x719   :  { %v1055_v3 = vmul.f32 %v1054_v1, %v1039_v50 }
 0x71b   :  { %v1060_v4 = vadd.f32 %v1059_v2, %v1055_v3 }
 0x71d   :  { %v1061_v5 = vmax.f32 %v1060_v4, 0.0 }
 0x71f   :  { %v1079_v6 = vpack.c.bf16 %v1061_v5, %v1061_v5 }
 0x721   :  { %1605 = vmatmul.mubr.bf16.vlgmr.msra.gmra.mrb[12].mxu0 %v1079_v6 }
 0x7f4   :  { %v1162_v15 = vpop.f32.mrb[12].mxu0 }
 0x7f5   :  { %v1168_v16 = vrot.slane %v1162_v15, 4  ;;  %v1606_v17 = vpop.f32.mrb[13].mxu0 }
 0x7f6   :  { %v1165_v18 = vpop.f32.mrb[14].mxu0 }
 0x7f7   :  { %v1169_v19 = vadd.f32 %v1168_v16, %v1162_v15  ;;  %v1607_v20 = vpop.f32.mrb[15].mxu0 }
 0x7f9   :  { %v1170_v22 = vrot.slane %v1169_v19, 2 }
 0x7fb   :  { %v1171_v23 = vadd.f32 %v1170_v22, %v1169_v19 }
 0x7fd   :  { %v1172_v24 = vrot.slane %v1171_v23, 1 }
 0x7ff   :  { %v1173_v25 = vadd.f32 %v1172_v24, %v1171_v23 }
 0x801   :  { %v1174_v26 = vmul.f32 0.125, %v1173_v25 }
 0x803   :  { %v1175_v27 = vsub.f32 %v1162_v15, %v1174_v26 }
 0x805   :  { %v1176_v28 = vmul.f32 %v1175_v27, %v1175_v27 }
 0x807   :  { %v1177_v29 = vrot.slane %v1176_v28, 4 }
 0x809   :  { %v1178_v30 = vadd.f32 %v1177_v29, %v1176_v28 }
 0x80b   :  { %v1179_v31 = vrot.slane %v1178_v30, 2 }
 0x80d   :  { %v1180_v32 = vadd.f32 %v1179_v31, %v1178_v30 }
 0x80f   :  { %v1181_v21 = vrot.slane %v1180_v32, 1 }
 0x811   :  { %v1182_v33 = vadd.f32 %v1181_v21, %v1180_v32 }
 0x813   :  { %v1183_v34 = vmul.f32 0.125, %v1182_v33 }
 0x815   :  { %v1184_v35 = vadd.f32 1e-05, %v1183_v34 }
 0x817   :  { %1726 = vrsqrt.f32 %v1184_v35 }
 0x821   :  { %v1727_v37 = vpop.eup %1726 }
 0x822   :  { %v1186_v38 = vmul.f32 %v1727_v37, %v1078_v36 }
 0x824   :  { %v1190_v39 = vrot.slane %v1186_v38, %v2213_v54 }
 0x826   :  { %v1191_v41 = vmul.f32 %v1190_v39, %v1175_v27 }
 0x828   :  { %v1196_v42 = vadd.f32 %v1195_v40, %v1191_v41 }
 0x82a   :  { %v1197_v43 = vmax.f32 %v1196_v42, 0.0 }
 0x82c   :  { %v1215_v44 = vpack.c.bf16 %v1197_v43, %v1197_v43 }
 0x82e   :  { %1625 = vmatmul.mubr.bf16.vlgmr.msra.gmra.mrb[12].mxu1 %v1215_v44 }
 0x901   :  { %v1304_v46 = vpop.f32.mrb[12].mxu1 }
 0x902   :  { %v1305_v47 = vadd.f32 %v1394_v45, %v1304_v46  ;;  %v1626_v48 = vpop.f32.mrb[13].mxu1 }
 0x903   :  { %v1307_v49 = vpop.f32.mrb[14].mxu1 }
 0x904   :  { %1310 = vst [vmem:[#allocation17] sm:$0xff] %v1305_v47  ;;  %v1627_v54 = vpop.f32.mrb[15].mxu1 }
 0x905   :  { %1937 = shalt.err (!%p1934_p6)
}
 0x906   :  { %s2348_s0 = sld [smem:[#allocation27_spill]] }
 0x90c   :  { %s1938_s29 = scalar_lea.hbm %s2348_s0, 128 }
 0x90d   :  { %p1939_p7 = scmp.ne.s32.totalorder %s2348_s0, %s1938_s29  ;;  %p1942_p8 = scmp.lt.u32.totalorder %s1938_s29, %s2348_s0 }
 0x90f   :  { %p1944_p9 = pnand %p1942_p8, %p1939_p7 }
 0x911   :  { %1947 = shalt.err (!%p1944_p9)
}
 0x912   :  { %1320 = dma.vmem_to_hbm [thread:$0]  %s1318_s9, 128, %s2348_s0, [#allocation4]  }
 0x913   :  { %1958 = dma.done.wait [#allocation4], 128  }
 0x914   :  { %1959 = vsyncadd [#allocation4], 4294967168 }
 0x915   :  { %1324 = vsyncpa [#allocation3], 1 }
 0x916   :  { %1325 = vsyncpa [#allocation6], 1 }
 0x917   :  { %1326 = vsyncpa [#allocation9], 1 }
 0x918   :  { %1327 = vsyncpa [#allocation12], 1 }
 0x919   :  { %1328 = vsyncpa [#allocation15], 1 }
 0x91a   :  { %1329 = vsyncpa [#allocation4], 1 }

</bundles_post_ra>
